<compile_context>
chip_gen: v7x
topology: tpu7x:2x2x1
jax: 0.10.0
libtpu: 0.0.40
codegen_flags: <defaults>
</compile_context>

<pallas_src>
import functools
import math

import jax
import jax.numpy as jnp
from jax.experimental import pallas as pl
from jax.experimental.pallas import tpu as pltpu

# ----------------------------- model dims (small, synthetic) -----------------------------
B = 2            # batch
S = 8            # sequence length
D = 32           # dmodel
H = 4            # heads
DH = D // H      # head dim
FF = 4 * D       # MLP hidden
VOCAB = 512      # token_vocab_size (len(tokenizer) + 256, synthetic)
NUM_LAYERS = 2
LN_EPS = 1e-5
NEG_INF = -1e30


def _layer_norm(x, g, b):
    mu = jnp.mean(x, axis=-1, keepdims=True)
    var = jnp.mean((x - mu) ** 2, axis=-1, keepdims=True)
    return (x - mu) * jax.lax.rsqrt(var + LN_EPS) * g + b


# --------------- fused kernel: mask prep + L layers + readout, one batch element / step ---------------
def fused_decoder_kernel(mask_ref, x_ref,
                         ln1g_ref, ln1b_ref, wqkv_ref, bqkv_ref, wo_ref, bo_ref,
                         ln2g_ref, ln2b_ref, w1_ref, b1_ref, w2_ref, b2_ref,
                         wout_ref, bout_ref,
                         o_ref, *, num_layers, num_heads, seq):
    d_model = x_ref.shape[-1]
    d_head = d_model // num_heads
    scale = 1.0 / math.sqrt(d_head)

    # ---- additive attention bias (prepare_attention_mask + causal), computed ONCE per step ----
    m = mask_ref[...].reshape(1, seq)                           # (1, S) f32, this batch element
    prod = m[:, :, None] * m[:, None, :]                        # (1, S, S)
    pad_bias = jnp.where(prod == 0.0, jnp.float32(-10000.0),
                         jnp.where(prod == 1.0, jnp.float32(0.0), prod))
    row = jax.lax.broadcasted_iota(jnp.int32, (seq, seq), 0)
    col = jax.lax.broadcasted_iota(jnp.int32, (seq, seq), 1)
    causal = jnp.where(col <= row, 0.0, NEG_INF).astype(jnp.float32)
    bias = pad_bias + causal[None, :, :]                        # (1, S, S) -> broadcasts over heads

    x = x_ref[...]                                              # (S, D) f32

    for l in range(num_layers):                                 # static unroll over layers
        # --- pre-LN 1 + fused QKV projection (bf16 weights, f32 accumulate) ---
        xn = _layer_norm(x, ln1g_ref[l], ln1b_ref[l])
        qkv = jnp.dot(xn.astype(jnp.bfloat16), wqkv_ref[l],
                      preferred_element_type=jnp.float32) + bqkv_ref[l]
        q = qkv[:, 0 * d_model:1 * d_model] * scale             # scale folded into q once
        k = qkv[:, 1 * d_model:2 * d_model]
        v = qkv[:, 2 * d_model:3 * d_model]

        # --- split heads to a leading batch axis (H, S, DH); attention batched over ALL heads ---
        q3 = jnp.stack([q[:, h * d_head:(h + 1) * d_head] for h in range(num_heads)], axis=0)
        k3 = jnp.stack([k[:, h * d_head:(h + 1) * d_head] for h in range(num_heads)], axis=0)
        v3 = jnp.stack([v[:, h * d_head:(h + 1) * d_head] for h in range(num_heads)], axis=0)

        s = jnp.einsum('hqd,hkd->hqk', q3, k3,
                       preferred_element_type=jnp.float32) + bias       # (H, S, S)
        s = s - jnp.max(s, axis=-1, keepdims=True)
        p = jnp.exp(s)
        p = p * pl.reciprocal(jnp.sum(p, axis=-1, keepdims=True), approx=True)
        o3 = jnp.einsum('hqk,hkd->hqd', p, v3,
                        preferred_element_type=jnp.float32)             # (H, S, DH)

        # merge heads in-register (no VMEM scratch, no masked stores)
        attn = jnp.concatenate([o3[h] for h in range(num_heads)], axis=-1)   # (S, D)
        attn = jnp.dot(attn.astype(jnp.bfloat16), wo_ref[l],
                       preferred_element_type=jnp.float32) + bo_ref[l]
        x = x + attn                                            # residual 1

        # --- pre-LN 2 + MLP ---
        xn2 = _layer_norm(x, ln2g_ref[l], ln2b_ref[l])
        h1 = jnp.dot(xn2.astype(jnp.bfloat16), w1_ref[l],
                     preferred_element_type=jnp.float32) + b1_ref[l]
        h1 = jax.nn.gelu(h1)                                    # tanh-approx GELU (see TODO)
        h2 = jnp.dot(h1.astype(jnp.bfloat16), w2_ref[l],
                     preferred_element_type=jnp.float32) + b2_ref[l]
        x = x + h2                                              # residual 2

    # --- MuReadout: logits = x @ W * output_mult(=1.0) + b ; lane-dense (S, VOCAB) store ---
    o_ref[...] = jnp.dot(x.astype(jnp.bfloat16), wout_ref[...],
                         preferred_element_type=jnp.float32) + bout_ref[...]


# ----------------------------- full forward (baseline path) -----------------------------
def transformer_decoder_forward(params, input_ids, attention_mask=None):
    Bq, Sq = input_ids.shape
    if attention_mask is None:
        attention_mask = jnp.ones((Bq, Sq), jnp.float32)
    attention_mask = attention_mask.astype(jnp.float32).reshape(Bq, 1, Sq)

    # embedding lookup (gather) stays in JAX glue
    x = jnp.take(params["token_embeddings"], input_ids, axis=0)      # (B, S, D) f32
    d_model = x.shape[-1]
    x = x.reshape(Bq * Sq, d_model)                                  # flatten to (B*S, D)

    num_layers = params["ln1_g"].shape[0]
    vocab = params["readout_w"].shape[-1]

    weights = (params["ln1_g"], params["ln1_b"], params["wqkv"], params["bqkv"],
               params["wo"], params["bo"], params["ln2_g"], params["ln2_b"],
               params["w1"], params["b1"], params["w2"], params["b2"],
               params["readout_w"], params["readout_b"])

    def rep_spec(a):                         # weights: same (whole-array) block every step
        nd = a.ndim
        return pl.BlockSpec(a.shape, lambda b, _nd=nd: (0,) * _nd)

    in_specs = ([pl.BlockSpec((1, 1, Sq), lambda b: (b, 0, 0)),      # this batch's mask row
                 pl.BlockSpec((Sq, d_model), lambda b: (b, 0))]      # this batch's (S, D) rows
                + [rep_spec(w) for w in weights])

    logits = pl.pallas_call(
        functools.partial(fused_decoder_kernel, num_layers=num_layers,
                          num_heads=H, seq=Sq),
        grid=(Bq,),
        out_shape=jax.ShapeDtypeStruct((Bq * Sq, vocab), jnp.float32),
        in_specs=in_specs,
        out_specs=pl.BlockSpec((Sq, vocab), lambda b: (b, 0)),
        compiler_params=pltpu.CompilerParams(
            dimension_semantics=("parallel",),                       # shard batch over v7x's 2 TCs
            vmem_limit_bytes=32 * 1024 * 1024),
    )(attention_mask, x, *weights)

    return logits.reshape(Bq, Sq, vocab)                             # (B, S, VOCAB)


# ----------------------------- parameter init (deterministic, layer-stacked) -----------------------------
def init_params(key):
    ks = iter(jax.random.split(key, 16))

    def n(shape):
        return jax.random.normal(next(ks), shape, jnp.float32) * 0.02

    return {
        "token_embeddings": n((VOCAB, D)),                                    # f32 (gather in glue)
        # per-layer params stacked along a leading layer axis
        "ln1_g": jnp.ones((NUM_LAYERS, D), jnp.float32),
        "ln1_b": jnp.zeros((NUM_LAYERS, D), jnp.float32),
        "wqkv": n((NUM_LAYERS, D, 3 * D)).astype(jnp.bfloat16),
        "bqkv": jnp.zeros((NUM_LAYERS, 3 * D), jnp.float32),
        "wo": n((NUM_LAYERS, D, D)).astype(jnp.bfloat16),
        "bo": jnp.zeros((NUM_LAYERS, D), jnp.float32),
        "ln2_g": jnp.ones((NUM_LAYERS, D), jnp.float32),
        "ln2_b": jnp.zeros((NUM_LAYERS, D), jnp.float32),
        "w1": n((NUM_LAYERS, D, FF)).astype(jnp.bfloat16),
        "b1": jnp.zeros((NUM_LAYERS, FF), jnp.float32),
        "w2": n((NUM_LAYERS, FF, D)).astype(jnp.bfloat16),
        "b2": jnp.zeros((NUM_LAYERS, D), jnp.float32),
        # readout
        "readout_w": n((D, VOCAB)).astype(jnp.bfloat16),
        "readout_b": jnp.zeros((1, VOCAB), jnp.float32),
    }


if __name__ == "__main__":
    key = jax.random.PRNGKey(0)
    kp, kd = jax.random.split(key)
    params = init_params(kp)

    input_ids = jax.random.randint(kd, (B, S), 0, VOCAB, dtype=jnp.int32)
    attention_mask = jnp.ones((B, S), jnp.float32)
    attention_mask = attention_mask.at[1, -2:].set(0.0)   # some padding in batch 1

    logits = transformer_decoder_forward(params, input_ids, attention_mask)
    jax.block_until_ready(logits)
    assert logits.shape == (B, S, VOCAB)
    print("KERNEL_OK")
</pallas_src>

<mosaic_0001>
module attributes {stable_mosaic.version = 11 : i64} {
  func.func @fused_decoder_kernel(%arg0: i32, %arg1: memref<1x1x8xf32, #tpu.memory_space<vmem>>, %arg2: memref<8x32xf32, #tpu.memory_space<vmem>>, %arg3: memref<2x32xf32, #tpu.memory_space<vmem>>, %arg4: memref<2x32xf32, #tpu.memory_space<vmem>>, %arg5: memref<2x32x96xbf16, #tpu.memory_space<vmem>>, %arg6: memref<2x96xf32, #tpu.memory_space<vmem>>, %arg7: memref<2x32x32xbf16, #tpu.memory_space<vmem>>, %arg8: memref<2x32xf32, #tpu.memory_space<vmem>>, %arg9: memref<2x32xf32, #tpu.memory_space<vmem>>, %arg10: memref<2x32xf32, #tpu.memory_space<vmem>>, %arg11: memref<2x32x128xbf16, #tpu.memory_space<vmem>>, %arg12: memref<2x128xf32, #tpu.memory_space<vmem>>, %arg13: memref<2x128x32xbf16, #tpu.memory_space<vmem>>, %arg14: memref<2x32xf32, #tpu.memory_space<vmem>>, %arg15: memref<32x512xbf16, #tpu.memory_space<vmem>>, %arg16: memref<1x512xf32, #tpu.memory_space<vmem>>, %arg17: memref<8x512xf32, #tpu.memory_space<vmem>>) attributes {dimension_semantics = [#tpu.dimension_semantics<parallel>], iteration_bounds = array<i64: 2>, scalar_prefetch = 0 : i64, scratch_operands = 0 : i64, tpu.core_type = #tpu.core_type<tc>, window_params = [{transform_indices = @transform_0, window_bounds = array<i64: 1, 1, 8>}, {transform_indices = @transform_1, window_bounds = array<i64: 8, 32>}, {pipeline_mode = #tpu.pipeline_mode<synchronous>, transform_indices = @transform_2, window_bounds = array<i64: 2, 32>}, {pipeline_mode = #tpu.pipeline_mode<synchronous>, transform_indices = @transform_3, window_bounds = array<i64: 2, 32>}, {pipeline_mode = #tpu.pipeline_mode<synchronous>, transform_indices = @transform_4, window_bounds = array<i64: 2, 32, 96>}, {pipeline_mode = #tpu.pipeline_mode<synchronous>, transform_indices = @transform_5, window_bounds = array<i64: 2, 96>}, {pipeline_mode = #tpu.pipeline_mode<synchronous>, transform_indices = @transform_6, window_bounds = array<i64: 2, 32, 32>}, {pipeline_mode = #tpu.pipeline_mode<synchronous>, transform_indices = @transform_7, window_bounds = array<i64: 2, 32>}, {pipeline_mode = #tpu.pipeline_mode<synchronous>, transform_indices = @transform_8, window_bounds = array<i64: 2, 32>}, {pipeline_mode = #tpu.pipeline_mode<synchronous>, transform_indices = @transform_9, window_bounds = array<i64: 2, 32>}, {pipeline_mode = #tpu.pipeline_mode<synchronous>, transform_indices = @transform_10, window_bounds = array<i64: 2, 32, 128>}, {pipeline_mode = #tpu.pipeline_mode<synchronous>, transform_indices = @transform_11, window_bounds = array<i64: 2, 128>}, {pipeline_mode = #tpu.pipeline_mode<synchronous>, transform_indices = @transform_12, window_bounds = array<i64: 2, 128, 32>}, {pipeline_mode = #tpu.pipeline_mode<synchronous>, transform_indices = @transform_13, window_bounds = array<i64: 2, 32>}, {pipeline_mode = #tpu.pipeline_mode<synchronous>, transform_indices = @transform_14, window_bounds = array<i64: 32, 512>}, {pipeline_mode = #tpu.pipeline_mode<synchronous>, transform_indices = @transform_15, window_bounds = array<i64: 1, 512>}, {transform_indices = @transform_16, window_bounds = array<i64: 8, 512>}]} {
    %c0 = arith.constant 0 : index
    %c0_0 = arith.constant 0 : index
    %c0_1 = arith.constant 0 : index
    %0 = vector.load %arg1[%c0, %c0_0, %c0_1] : memref<1x1x8xf32, #tpu.memory_space<vmem>>, vector<1x1x8xf32>
    %1 = vector.shape_cast %0 : vector<1x1x8xf32> to vector<1x8xf32>
    %2 = vector.shape_cast %1 : vector<1x8xf32> to vector<1x8x1xf32>
    %3 = vector.shape_cast %1 : vector<1x8xf32> to vector<1x1x8xf32>
    %4 = vector.broadcast %2 : vector<1x8x1xf32> to vector<1x8x8xf32>
    %5 = vector.broadcast %3 : vector<1x1x8xf32> to vector<1x8x8xf32>
    %6 = arith.mulf %4, %5 : vector<1x8x8xf32>
    %cst = arith.constant 0.000000e+00 : f32
    %7 = vector.broadcast %cst : f32 to vector<1x8x8xf32>
    %8 = arith.cmpf oeq, %6, %7 : vector<1x8x8xf32>
    %cst_2 = arith.constant 1.000000e+00 : f32
    %9 = vector.broadcast %cst_2 : f32 to vector<1x8x8xf32>
    %10 = arith.cmpf oeq, %6, %9 : vector<1x8x8xf32>
    %cst_3 = arith.constant 0.000000e+00 : f32
    %11 = vector.broadcast %cst_3 : f32 to vector<1x8x8xf32>
    %12 = arith.select %10, %11, %6 : vector<1x8x8xi1>, vector<1x8x8xf32>
    %cst_4 = arith.constant -1.000000e+04 : f32
    %13 = vector.broadcast %cst_4 : f32 to vector<1x8x8xf32>
    %14 = arith.select %8, %13, %12 : vector<1x8x8xi1>, vector<1x8x8xf32>
    %15 = tpu.iota {dimensions = array<i32: 0>} : vector<8x8xi32>
    %16 = tpu.iota {dimensions = array<i32: 1>} : vector<8x8xi32>
    %17 = arith.cmpi sle, %16, %15 : vector<8x8xi32>
    %cst_5 = arith.constant 0.000000e+00 : f32
    %cst_6 = arith.constant -1.000000e+30 : f32
    %18 = vector.broadcast %cst_5 : f32 to vector<8x8xf32>
    %19 = vector.broadcast %cst_6 : f32 to vector<8x8xf32>
    %20 = arith.select %17, %18, %19 : vector<8x8xi1>, vector<8x8xf32>
    %21 = vector.shape_cast %20 : vector<8x8xf32> to vector<1x8x8xf32>
    %22 = arith.addf %14, %21 : vector<1x8x8xf32>
    %c0_7 = arith.constant 0 : index
    %c0_8 = arith.constant 0 : index
    %23 = vector.load %arg2[%c0_7, %c0_8] : memref<8x32xf32, #tpu.memory_space<vmem>>, vector<8x32xf32>
    %c0_9 = arith.constant 0 : index
    %c0_10 = arith.constant 0 : index
    %24 = vector.load %arg3[%c0_9, %c0_10] : memref<2x32xf32, #tpu.memory_space<vmem>>, vector<1x32xf32>
    %25 = vector.shape_cast %24 : vector<1x32xf32> to vector<32xf32>
    %c0_11 = arith.constant 0 : index
    %c0_12 = arith.constant 0 : index
    %26 = vector.load %arg4[%c0_11, %c0_12] : memref<2x32xf32, #tpu.memory_space<vmem>>, vector<1x32xf32>
    %27 = vector.shape_cast %26 : vector<1x32xf32> to vector<32xf32>
    %cst_13 = arith.constant dense<0.000000e+00> : vector<8xf32>
    %28 = vector.multi_reduction <add>, %23, %cst_13 [1] : vector<8x32xf32> to vector<8xf32>
    %29 = vector.shape_cast %28 : vector<8xf32> to vector<8x1xf32>
    %cst_14 = arith.constant 3.200000e+01 : f32
    %30 = vector.broadcast %cst_14 : f32 to vector<8x1xf32>
    %31 = arith.divf %29, %30 : vector<8x1xf32>
    %32 = vector.broadcast %31 : vector<8x1xf32> to vector<8x32xf32>
    %33 = arith.subf %23, %32 : vector<8x32xf32>
    %34 = arith.mulf %33, %33 : vector<8x32xf32>
    %cst_15 = arith.constant dense<0.000000e+00> : vector<8xf32>
    %35 = vector.multi_reduction <add>, %34, %cst_15 [1] : vector<8x32xf32> to vector<8xf32>
    %36 = vector.shape_cast %35 : vector<8xf32> to vector<8x1xf32>
    %cst_16 = arith.constant 3.200000e+01 : f32
    %37 = vector.broadcast %cst_16 : f32 to vector<8x1xf32>
    %38 = arith.divf %36, %37 : vector<8x1xf32>
    %39 = vector.broadcast %31 : vector<8x1xf32> to vector<8x32xf32>
    %40 = arith.subf %23, %39 : vector<8x32xf32>
    %cst_17 = arith.constant 9.99999974E-6 : f32
    %41 = vector.broadcast %cst_17 : f32 to vector<8x1xf32>
    %42 = arith.addf %38, %41 : vector<8x1xf32>
    %43 = math.rsqrt %42 : vector<8x1xf32>
    %44 = vector.broadcast %43 : vector<8x1xf32> to vector<8x32xf32>
    %45 = arith.mulf %40, %44 : vector<8x32xf32>
    %46 = vector.shape_cast %25 : vector<32xf32> to vector<1x32xf32>
    %47 = vector.broadcast %46 : vector<1x32xf32> to vector<8x32xf32>
    %48 = arith.mulf %45, %47 : vector<8x32xf32>
    %49 = vector.shape_cast %27 : vector<32xf32> to vector<1x32xf32>
    %50 = vector.broadcast %49 : vector<1x32xf32> to vector<8x32xf32>
    %51 = arith.addf %48, %50 : vector<8x32xf32>
    %52 = arith.truncf %51 : vector<8x32xf32> to vector<8x32xbf16>
    %c0_18 = arith.constant 0 : index
    %c0_19 = arith.constant 0 : index
    %c0_20 = arith.constant 0 : index
    %53 = vector.load %arg5[%c0_18, %c0_19, %c0_20] : memref<2x32x96xbf16, #tpu.memory_space<vmem>>, vector<1x32x96xbf16>
    %54 = vector.shape_cast %53 : vector<1x32x96xbf16> to vector<32x96xbf16>
    %cst_21 = arith.constant dense<0.000000e+00> : vector<8x96xf32>
    %55 = tpu.matmul %52, %54, %cst_21 {dimension_numbers = #tpu.dot_dimension_numbers<[1], [0], [0], [1], [0, 0, 1, 1], [], []>} : vector<8x32xbf16>, vector<32x96xbf16>, vector<8x96xf32> -> vector<8x96xf32>
    %c0_22 = arith.constant 0 : index
    %c0_23 = arith.constant 0 : index
    %56 = vector.load %arg6[%c0_22, %c0_23] : memref<2x96xf32, #tpu.memory_space<vmem>>, vector<1x96xf32>
    %57 = vector.shape_cast %56 : vector<1x96xf32> to vector<96xf32>
    %58 = vector.shape_cast %57 : vector<96xf32> to vector<1x96xf32>
    %59 = vector.broadcast %58 : vector<1x96xf32> to vector<8x96xf32>
    %60 = arith.addf %55, %59 : vector<8x96xf32>
    %61 = vector.extract_strided_slice %60 {offsets = [0, 0], sizes = [8, 32], strides = [1, 1]} : vector<8x96xf32> to vector<8x32xf32>
    %cst_24 = arith.constant 0.353553385 : f32
    %62 = vector.broadcast %cst_24 : f32 to vector<8x32xf32>
    %63 = arith.mulf %61, %62 : vector<8x32xf32>
    %64 = vector.extract_strided_slice %60 {offsets = [0, 32], sizes = [8, 32], strides = [1, 1]} : vector<8x96xf32> to vector<8x32xf32>
    %65 = vector.extract_strided_slice %60 {offsets = [0, 64], sizes = [8, 32], strides = [1, 1]} : vector<8x96xf32> to vector<8x32xf32>
    %66 = vector.extract_strided_slice %63 {offsets = [0, 0], sizes = [8, 8], strides = [1, 1]} : vector<8x32xf32> to vector<8x8xf32>
    %67 = vector.extract_strided_slice %63 {offsets = [0, 8], sizes = [8, 8], strides = [1, 1]} : vector<8x32xf32> to vector<8x8xf32>
    %68 = vector.extract_strided_slice %63 {offsets = [0, 16], sizes = [8, 8], strides = [1, 1]} : vector<8x32xf32> to vector<8x8xf32>
    %69 = vector.extract_strided_slice %63 {offsets = [0, 24], sizes = [8, 8], strides = [1, 1]} : vector<8x32xf32> to vector<8x8xf32>
    %70 = vector.shape_cast %66 : vector<8x8xf32> to vector<1x8x8xf32>
    %71 = vector.shape_cast %67 : vector<8x8xf32> to vector<1x8x8xf32>
    %72 = vector.shape_cast %68 : vector<8x8xf32> to vector<1x8x8xf32>
    %73 = vector.shape_cast %69 : vector<8x8xf32> to vector<1x8x8xf32>
    %74 = tpu.concatenate %70, %71, %72, %73 in 0 : vector<1x8x8xf32>, vector<1x8x8xf32>, vector<1x8x8xf32>, vector<1x8x8xf32> -> vector<4x8x8xf32>
    %75 = vector.extract_strided_slice %64 {offsets = [0, 0], sizes = [8, 8], strides = [1, 1]} : vector<8x32xf32> to vector<8x8xf32>
    %76 = vector.extract_strided_slice %64 {offsets = [0, 8], sizes = [8, 8], strides = [1, 1]} : vector<8x32xf32> to vector<8x8xf32>
    %77 = vector.extract_strided_slice %64 {offsets = [0, 16], sizes = [8, 8], strides = [1, 1]} : vector<8x32xf32> to vector<8x8xf32>
    %78 = vector.extract_strided_slice %64 {offsets = [0, 24], sizes = [8, 8], strides = [1, 1]} : vector<8x32xf32> to vector<8x8xf32>
    %79 = vector.shape_cast %75 : vector<8x8xf32> to vector<1x8x8xf32>
    %80 = vector.shape_cast %76 : vector<8x8xf32> to vector<1x8x8xf32>
    %81 = vector.shape_cast %77 : vector<8x8xf32> to vector<1x8x8xf32>
    %82 = vector.shape_cast %78 : vector<8x8xf32> to vector<1x8x8xf32>
    %83 = tpu.concatenate %79, %80, %81, %82 in 0 : vector<1x8x8xf32>, vector<1x8x8xf32>, vector<1x8x8xf32>, vector<1x8x8xf32> -> vector<4x8x8xf32>
    %84 = vector.extract_strided_slice %65 {offsets = [0, 0], sizes = [8, 8], strides = [1, 1]} : vector<8x32xf32> to vector<8x8xf32>
    %85 = vector.extract_strided_slice %65 {offsets = [0, 8], sizes = [8, 8], strides = [1, 1]} : vector<8x32xf32> to vector<8x8xf32>
    %86 = vector.extract_strided_slice %65 {offsets = [0, 16], sizes = [8, 8], strides = [1, 1]} : vector<8x32xf32> to vector<8x8xf32>
    %87 = vector.extract_strided_slice %65 {offsets = [0, 24], sizes = [8, 8], strides = [1, 1]} : vector<8x32xf32> to vector<8x8xf32>
    %88 = vector.shape_cast %84 : vector<8x8xf32> to vector<1x8x8xf32>
    %89 = vector.shape_cast %85 : vector<8x8xf32> to vector<1x8x8xf32>
    %90 = vector.shape_cast %86 : vector<8x8xf32> to vector<1x8x8xf32>
    %91 = vector.shape_cast %87 : vector<8x8xf32> to vector<1x8x8xf32>
    %92 = tpu.concatenate %88, %89, %90, %91 in 0 : vector<1x8x8xf32>, vector<1x8x8xf32>, vector<1x8x8xf32>, vector<1x8x8xf32> -> vector<4x8x8xf32>
    "tpu.trace_start"() <{level = 10 : i32, message = "hqd,hkd->hqk"}> : () -> ()
    %cst_25 = arith.constant dense<0.000000e+00> : vector<4x8x8xf32>
    %93 = tpu.matmul %74, %83, %cst_25 {dimension_numbers = #tpu.dot_dimension_numbers<[2], [2], [1], [1], [0, 0, 0, 1, 1, 1], [0], [0]>} : vector<4x8x8xf32>, vector<4x8x8xf32>, vector<4x8x8xf32> -> vector<4x8x8xf32>
    "tpu.trace_stop"() : () -> ()
    %94 = vector.broadcast %22 : vector<1x8x8xf32> to vector<4x8x8xf32>
    %95 = arith.addf %93, %94 : vector<4x8x8xf32>
    %cst_26 = arith.constant dense<0xFF800000> : vector<4x8xf32>
    %96 = vector.multi_reduction <maximumf>, %95, %cst_26 [2] : vector<4x8x8xf32> to vector<4x8xf32>
    %97 = vector.shape_cast %96 : vector<4x8xf32> to vector<4x8x1xf32>
    %98 = vector.broadcast %97 : vector<4x8x1xf32> to vector<4x8x8xf32>
    %99 = arith.subf %95, %98 : vector<4x8x8xf32>
    %100 = math.exp %99 : vector<4x8x8xf32>
    %cst_27 = arith.constant dense<0.000000e+00> : vector<4x8xf32>
    %101 = vector.multi_reduction <add>, %100, %cst_27 [2] : vector<4x8x8xf32> to vector<4x8xf32>
    %102 = vector.shape_cast %101 : vector<4x8xf32> to vector<4x8x1xf32>
    %103 = tpu.reciprocal %102 {approx = true} : vector<4x8x1xf32> -> vector<4x8x1xf32>
    %104 = vector.broadcast %103 : vector<4x8x1xf32> to vector<4x8x8xf32>
    %105 = arith.mulf %100, %104 : vector<4x8x8xf32>
    "tpu.trace_start"() <{level = 10 : i32, message = "hqk,hkd->hqd"}> : () -> ()
    %cst_28 = arith.constant dense<0.000000e+00> : vector<4x8x8xf32>
    %106 = tpu.matmul %105, %92, %cst_28 {dimension_numbers = #tpu.dot_dimension_numbers<[2], [1], [1], [2], [0, 0, 0, 1, 1, 2], [0], [0]>} : vector<4x8x8xf32>, vector<4x8x8xf32>, vector<4x8x8xf32> -> vector<4x8x8xf32>
    "tpu.trace_stop"() : () -> ()
    %107 = vector.extract_strided_slice %106 {offsets = [0, 0, 0], sizes = [1, 8, 8], strides = [1, 1, 1]} : vector<4x8x8xf32> to vector<1x8x8xf32>
    %108 = vector.shape_cast %107 : vector<1x8x8xf32> to vector<8x8xf32>
    %109 = vector.extract_strided_slice %106 {offsets = [1, 0, 0], sizes = [1, 8, 8], strides = [1, 1, 1]} : vector<4x8x8xf32> to vector<1x8x8xf32>
    %110 = vector.shape_cast %109 : vector<1x8x8xf32> to vector<8x8xf32>
    %111 = vector.extract_strided_slice %106 {offsets = [2, 0, 0], sizes = [1, 8, 8], strides = [1, 1, 1]} : vector<4x8x8xf32> to vector<1x8x8xf32>
    %112 = vector.shape_cast %111 : vector<1x8x8xf32> to vector<8x8xf32>
    %113 = vector.extract_strided_slice %106 {offsets = [3, 0, 0], sizes = [1, 8, 8], strides = [1, 1, 1]} : vector<4x8x8xf32> to vector<1x8x8xf32>
    %114 = vector.shape_cast %113 : vector<1x8x8xf32> to vector<8x8xf32>
    %115 = tpu.concatenate %108, %110, %112, %114 in 1 : vector<8x8xf32>, vector<8x8xf32>, vector<8x8xf32>, vector<8x8xf32> -> vector<8x32xf32>
    %116 = arith.truncf %115 : vector<8x32xf32> to vector<8x32xbf16>
    %c0_29 = arith.constant 0 : index
    %c0_30 = arith.constant 0 : index
    %c0_31 = arith.constant 0 : index
    %117 = vector.load %arg7[%c0_29, %c0_30, %c0_31] : memref<2x32x32xbf16, #tpu.memory_space<vmem>>, vector<1x32x32xbf16>
    %118 = vector.shape_cast %117 : vector<1x32x32xbf16> to vector<32x32xbf16>
    %cst_32 = arith.constant dense<0.000000e+00> : vector<8x32xf32>
    %119 = tpu.matmul %116, %118, %cst_32 {dimension_numbers = #tpu.dot_dimension_numbers<[1], [0], [0], [1], [0, 0, 1, 1], [], []>} : vector<8x32xbf16>, vector<32x32xbf16>, vector<8x32xf32> -> vector<8x32xf32>
    %c0_33 = arith.constant 0 : index
    %c0_34 = arith.constant 0 : index
    %120 = vector.load %arg8[%c0_33, %c0_34] : memref<2x32xf32, #tpu.memory_space<vmem>>, vector<1x32xf32>
    %121 = vector.shape_cast %120 : vector<1x32xf32> to vector<32xf32>
    %122 = vector.shape_cast %121 : vector<32xf32> to vector<1x32xf32>
    %123 = vector.broadcast %122 : vector<1x32xf32> to vector<8x32xf32>
    %124 = arith.addf %119, %123 : vector<8x32xf32>
    %125 = arith.addf %23, %124 : vector<8x32xf32>
    %c0_35 = arith.constant 0 : index
    %c0_36 = arith.constant 0 : index
    %126 = vector.load %arg9[%c0_35, %c0_36] : memref<2x32xf32, #tpu.memory_space<vmem>>, vector<1x32xf32>
    %127 = vector.shape_cast %126 : vector<1x32xf32> to vector<32xf32>
    %c0_37 = arith.constant 0 : index
    %c0_38 = arith.constant 0 : index
    %128 = vector.load %arg10[%c0_37, %c0_38] : memref<2x32xf32, #tpu.memory_space<vmem>>, vector<1x32xf32>
    %129 = vector.shape_cast %128 : vector<1x32xf32> to vector<32xf32>
    %cst_39 = arith.constant dense<0.000000e+00> : vector<8xf32>
    %130 = vector.multi_reduction <add>, %125, %cst_39 [1] : vector<8x32xf32> to vector<8xf32>
    %131 = vector.shape_cast %130 : vector<8xf32> to vector<8x1xf32>
    %cst_40 = arith.constant 3.200000e+01 : f32
    %132 = vector.broadcast %cst_40 : f32 to vector<8x1xf32>
    %133 = arith.divf %131, %132 : vector<8x1xf32>
    %134 = vector.broadcast %133 : vector<8x1xf32> to vector<8x32xf32>
    %135 = arith.subf %125, %134 : vector<8x32xf32>
    %136 = arith.mulf %135, %135 : vector<8x32xf32>
    %cst_41 = arith.constant dense<0.000000e+00> : vector<8xf32>
    %137 = vector.multi_reduction <add>, %136, %cst_41 [1] : vector<8x32xf32> to vector<8xf32>
    %138 = vector.shape_cast %137 : vector<8xf32> to vector<8x1xf32>
    %cst_42 = arith.constant 3.200000e+01 : f32
    %139 = vector.broadcast %cst_42 : f32 to vector<8x1xf32>
    %140 = arith.divf %138, %139 : vector<8x1xf32>
    %141 = vector.broadcast %133 : vector<8x1xf32> to vector<8x32xf32>
    %142 = arith.subf %125, %141 : vector<8x32xf32>
    %cst_43 = arith.constant 9.99999974E-6 : f32
    %143 = vector.broadcast %cst_43 : f32 to vector<8x1xf32>
    %144 = arith.addf %140, %143 : vector<8x1xf32>
    %145 = math.rsqrt %144 : vector<8x1xf32>
    %146 = vector.broadcast %145 : vector<8x1xf32> to vector<8x32xf32>
    %147 = arith.mulf %142, %146 : vector<8x32xf32>
    %148 = vector.shape_cast %127 : vector<32xf32> to vector<1x32xf32>
    %149 = vector.broadcast %148 : vector<1x32xf32> to vector<8x32xf32>
    %150 = arith.mulf %147, %149 : vector<8x32xf32>
    %151 = vector.shape_cast %129 : vector<32xf32> to vector<1x32xf32>
    %152 = vector.broadcast %151 : vector<1x32xf32> to vector<8x32xf32>
    %153 = arith.addf %150, %152 : vector<8x32xf32>
    %154 = arith.truncf %153 : vector<8x32xf32> to vector<8x32xbf16>
    %c0_44 = arith.constant 0 : index
    %c0_45 = arith.constant 0 : index
    %c0_46 = arith.constant 0 : index
    %155 = vector.load %arg11[%c0_44, %c0_45, %c0_46] : memref<2x32x128xbf16, #tpu.memory_space<vmem>>, vector<1x32x128xbf16>
    %156 = vector.shape_cast %155 : vector<1x32x128xbf16> to vector<32x128xbf16>
    %cst_47 = arith.constant dense<0.000000e+00> : vector<8x128xf32>
    %157 = tpu.matmul %154, %156, %cst_47 {dimension_numbers = #tpu.dot_dimension_numbers<[1], [0], [0], [1], [0, 0, 1, 1], [], []>} : vector<8x32xbf16>, vector<32x128xbf16>, vector<8x128xf32> -> vector<8x128xf32>
    %c0_48 = arith.constant 0 : index
    %c0_49 = arith.constant 0 : index
    %158 = vector.load %arg12[%c0_48, %c0_49] : memref<2x128xf32, #tpu.memory_space<vmem>>, vector<1x128xf32>
    %159 = vector.shape_cast %158 : vector<1x128xf32> to vector<128xf32>
    %160 = vector.shape_cast %159 : vector<128xf32> to vector<1x128xf32>
    %161 = vector.broadcast %160 : vector<1x128xf32> to vector<8x128xf32>
    %162 = arith.addf %157, %161 : vector<8x128xf32>
    %163 = arith.mulf %162, %162 : vector<8x128xf32>
    %164 = arith.mulf %162, %163 : vector<8x128xf32>
    %cst_50 = arith.constant 4.471500e-02 : f32
    %165 = vector.broadcast %cst_50 : f32 to vector<8x128xf32>
    %166 = arith.mulf %165, %164 : vector<8x128xf32>
    %167 = arith.addf %162, %166 : vector<8x128xf32>
    %cst_51 = arith.constant 0.797884583 : f32
    %168 = vector.broadcast %cst_51 : f32 to vector<8x128xf32>
    %169 = arith.mulf %168, %167 : vector<8x128xf32>
    %170 = math.tanh %169 : vector<8x128xf32>
    %cst_52 = arith.constant 1.000000e+00 : f32
    %171 = vector.broadcast %cst_52 : f32 to vector<8x128xf32>
    %172 = arith.addf %171, %170 : vector<8x128xf32>
    %cst_53 = arith.constant 5.000000e-01 : f32
    %173 = vector.broadcast %cst_53 : f32 to vector<8x128xf32>
    %174 = arith.mulf %173, %172 : vector<8x128xf32>
    %175 = arith.mulf %162, %174 : vector<8x128xf32>
    %176 = arith.truncf %175 : vector<8x128xf32> to vector<8x128xbf16>
    %c0_54 = arith.constant 0 : index
    %c0_55 = arith.constant 0 : index
    %c0_56 = arith.constant 0 : index
    %177 = vector.load %arg13[%c0_54, %c0_55, %c0_56] : memref<2x128x32xbf16, #tpu.memory_space<vmem>>, vector<1x128x32xbf16>
    %178 = vector.shape_cast %177 : vector<1x128x32xbf16> to vector<128x32xbf16>
    %cst_57 = arith.constant dense<0.000000e+00> : vector<8x32xf32>
    %179 = tpu.matmul %176, %178, %cst_57 {dimension_numbers = #tpu.dot_dimension_numbers<[1], [0], [0], [1], [0, 0, 1, 1], [], []>} : vector<8x128xbf16>, vector<128x32xbf16>, vector<8x32xf32> -> vector<8x32xf32>
    %c0_58 = arith.constant 0 : index
    %c0_59 = arith.constant 0 : index
    %180 = vector.load %arg14[%c0_58, %c0_59] : memref<2x32xf32, #tpu.memory_space<vmem>>, vector<1x32xf32>
    %181 = vector.shape_cast %180 : vector<1x32xf32> to vector<32xf32>
    %182 = vector.shape_cast %181 : vector<32xf32> to vector<1x32xf32>
    %183 = vector.broadcast %182 : vector<1x32xf32> to vector<8x32xf32>
    %184 = arith.addf %179, %183 : vector<8x32xf32>
    %185 = arith.addf %125, %184 : vector<8x32xf32>
    %c1 = arith.constant 1 : index
    %c0_60 = arith.constant 0 : index
    %186 = vector.load %arg3[%c1, %c0_60] : memref<2x32xf32, #tpu.memory_space<vmem>>, vector<1x32xf32>
    %187 = vector.shape_cast %186 : vector<1x32xf32> to vector<32xf32>
    %c1_61 = arith.constant 1 : index
    %c0_62 = arith.constant 0 : index
    %188 = vector.load %arg4[%c1_61, %c0_62] : memref<2x32xf32, #tpu.memory_space<vmem>>, vector<1x32xf32>
    %189 = vector.shape_cast %188 : vector<1x32xf32> to vector<32xf32>
    %cst_63 = arith.constant dense<0.000000e+00> : vector<8xf32>
    %190 = vector.multi_reduction <add>, %185, %cst_63 [1] : vector<8x32xf32> to vector<8xf32>
    %191 = vector.shape_cast %190 : vector<8xf32> to vector<8x1xf32>
    %cst_64 = arith.constant 3.200000e+01 : f32
    %192 = vector.broadcast %cst_64 : f32 to vector<8x1xf32>
    %193 = arith.divf %191, %192 : vector<8x1xf32>
    %194 = vector.broadcast %193 : vector<8x1xf32> to vector<8x32xf32>
    %195 = arith.subf %185, %194 : vector<8x32xf32>
    %196 = arith.mulf %195, %195 : vector<8x32xf32>
    %cst_65 = arith.constant dense<0.000000e+00> : vector<8xf32>
    %197 = vector.multi_reduction <add>, %196, %cst_65 [1] : vector<8x32xf32> to vector<8xf32>
    %198 = vector.shape_cast %197 : vector<8xf32> to vector<8x1xf32>
    %cst_66 = arith.constant 3.200000e+01 : f32
    %199 = vector.broadcast %cst_66 : f32 to vector<8x1xf32>
    %200 = arith.divf %198, %199 : vector<8x1xf32>
    %201 = vector.broadcast %193 : vector<8x1xf32> to vector<8x32xf32>
    %202 = arith.subf %185, %201 : vector<8x32xf32>
    %cst_67 = arith.constant 9.99999974E-6 : f32
    %203 = vector.broadcast %cst_67 : f32 to vector<8x1xf32>
    %204 = arith.addf %200, %203 : vector<8x1xf32>
    %205 = math.rsqrt %204 : vector<8x1xf32>
    %206 = vector.broadcast %205 : vector<8x1xf32> to vector<8x32xf32>
    %207 = arith.mulf %202, %206 : vector<8x32xf32>
    %208 = vector.shape_cast %187 : vector<32xf32> to vector<1x32xf32>
    %209 = vector.broadcast %208 : vector<1x32xf32> to vector<8x32xf32>
    %210 = arith.mulf %207, %209 : vector<8x32xf32>
    %211 = vector.shape_cast %189 : vector<32xf32> to vector<1x32xf32>
    %212 = vector.broadcast %211 : vector<1x32xf32> to vector<8x32xf32>
    %213 = arith.addf %210, %212 : vector<8x32xf32>
    %214 = arith.truncf %213 : vector<8x32xf32> to vector<8x32xbf16>
    %c1_68 = arith.constant 1 : index
    %c0_69 = arith.constant 0 : index
    %c0_70 = arith.constant 0 : index
    %215 = vector.load %arg5[%c1_68, %c0_69, %c0_70] : memref<2x32x96xbf16, #tpu.memory_space<vmem>>, vector<1x32x96xbf16>
    %216 = vector.shape_cast %215 : vector<1x32x96xbf16> to vector<32x96xbf16>
    %cst_71 = arith.constant dense<0.000000e+00> : vector<8x96xf32>
    %217 = tpu.matmul %214, %216, %cst_71 {dimension_numbers = #tpu.dot_dimension_numbers<[1], [0], [0], [1], [0, 0, 1, 1], [], []>} : vector<8x32xbf16>, vector<32x96xbf16>, vector<8x96xf32> -> vector<8x96xf32>
    %c1_72 = arith.constant 1 : index
    %c0_73 = arith.constant 0 : index
    %218 = vector.load %arg6[%c1_72, %c0_73] : memref<2x96xf32, #tpu.memory_space<vmem>>, vector<1x96xf32>
    %219 = vector.shape_cast %218 : vector<1x96xf32> to vector<96xf32>
    %220 = vector.shape_cast %219 : vector<96xf32> to vector<1x96xf32>
    %221 = vector.broadcast %220 : vector<1x96xf32> to vector<8x96xf32>
    %222 = arith.addf %217, %221 : vector<8x96xf32>
    %223 = vector.extract_strided_slice %222 {offsets = [0, 0], sizes = [8, 32], strides = [1, 1]} : vector<8x96xf32> to vector<8x32xf32>
    %cst_74 = arith.constant 0.353553385 : f32
    %224 = vector.broadcast %cst_74 : f32 to vector<8x32xf32>
    %225 = arith.mulf %223, %224 : vector<8x32xf32>
    %226 = vector.extract_strided_slice %222 {offsets = [0, 32], sizes = [8, 32], strides = [1, 1]} : vector<8x96xf32> to vector<8x32xf32>
    %227 = vector.extract_strided_slice %222 {offsets = [0, 64], sizes = [8, 32], strides = [1, 1]} : vector<8x96xf32> to vector<8x32xf32>
    %228 = vector.extract_strided_slice %225 {offsets = [0, 0], sizes = [8, 8], strides = [1, 1]} : vector<8x32xf32> to vector<8x8xf32>
    %229 = vector.extract_strided_slice %225 {offsets = [0, 8], sizes = [8, 8], strides = [1, 1]} : vector<8x32xf32> to vector<8x8xf32>
    %230 = vector.extract_strided_slice %225 {offsets = [0, 16], sizes = [8, 8], strides = [1, 1]} : vector<8x32xf32> to vector<8x8xf32>
    %231 = vector.extract_strided_slice %225 {offsets = [0, 24], sizes = [8, 8], strides = [1, 1]} : vector<8x32xf32> to vector<8x8xf32>
    %232 = vector.shape_cast %228 : vector<8x8xf32> to vector<1x8x8xf32>
    %233 = vector.shape_cast %229 : vector<8x8xf32> to vector<1x8x8xf32>
    %234 = vector.shape_cast %230 : vector<8x8xf32> to vector<1x8x8xf32>
    %235 = vector.shape_cast %231 : vector<8x8xf32> to vector<1x8x8xf32>
    %236 = tpu.concatenate %232, %233, %234, %235 in 0 : vector<1x8x8xf32>, vector<1x8x8xf32>, vector<1x8x8xf32>, vector<1x8x8xf32> -> vector<4x8x8xf32>
    %237 = vector.extract_strided_slice %226 {offsets = [0, 0], sizes = [8, 8], strides = [1, 1]} : vector<8x32xf32> to vector<8x8xf32>
    %238 = vector.extract_strided_slice %226 {offsets = [0, 8], sizes = [8, 8], strides = [1, 1]} : vector<8x32xf32> to vector<8x8xf32>
    %239 = vector.extract_strided_slice %226 {offsets = [0, 16], sizes = [8, 8], strides = [1, 1]} : vector<8x32xf32> to vector<8x8xf32>
    %240 = vector.extract_strided_slice %226 {offsets = [0, 24], sizes = [8, 8], strides = [1, 1]} : vector<8x32xf32> to vector<8x8xf32>
    %241 = vector.shape_cast %237 : vector<8x8xf32> to vector<1x8x8xf32>
    %242 = vector.shape_cast %238 : vector<8x8xf32> to vector<1x8x8xf32>
    %243 = vector.shape_cast %239 : vector<8x8xf32> to vector<1x8x8xf32>
    %244 = vector.shape_cast %240 : vector<8x8xf32> to vector<1x8x8xf32>
    %245 = tpu.concatenate %241, %242, %243, %244 in 0 : vector<1x8x8xf32>, vector<1x8x8xf32>, vector<1x8x8xf32>, vector<1x8x8xf32> -> vector<4x8x8xf32>
    %246 = vector.extract_strided_slice %227 {offsets = [0, 0], sizes = [8, 8], strides = [1, 1]} : vector<8x32xf32> to vector<8x8xf32>
    %247 = vector.extract_strided_slice %227 {offsets = [0, 8], sizes = [8, 8], strides = [1, 1]} : vector<8x32xf32> to vector<8x8xf32>
    %248 = vector.extract_strided_slice %227 {offsets = [0, 16], sizes = [8, 8], strides = [1, 1]} : vector<8x32xf32> to vector<8x8xf32>
    %249 = vector.extract_strided_slice %227 {offsets = [0, 24], sizes = [8, 8], strides = [1, 1]} : vector<8x32xf32> to vector<8x8xf32>
    %250 = vector.shape_cast %246 : vector<8x8xf32> to vector<1x8x8xf32>
    %251 = vector.shape_cast %247 : vector<8x8xf32> to vector<1x8x8xf32>
    %252 = vector.shape_cast %248 : vector<8x8xf32> to vector<1x8x8xf32>
    %253 = vector.shape_cast %249 : vector<8x8xf32> to vector<1x8x8xf32>
    %254 = tpu.concatenate %250, %251, %252, %253 in 0 : vector<1x8x8xf32>, vector<1x8x8xf32>, vector<1x8x8xf32>, vector<1x8x8xf32> -> vector<4x8x8xf32>
    "tpu.trace_start"() <{level = 10 : i32, message = "hqd,hkd->hqk"}> : () -> ()
    %cst_75 = arith.constant dense<0.000000e+00> : vector<4x8x8xf32>
    %255 = tpu.matmul %236, %245, %cst_75 {dimension_numbers = #tpu.dot_dimension_numbers<[2], [2], [1], [1], [0, 0, 0, 1, 1, 1], [0], [0]>} : vector<4x8x8xf32>, vector<4x8x8xf32>, vector<4x8x8xf32> -> vector<4x8x8xf32>
    "tpu.trace_stop"() : () -> ()
    %256 = vector.broadcast %22 : vector<1x8x8xf32> to vector<4x8x8xf32>
    %257 = arith.addf %255, %256 : vector<4x8x8xf32>
    %cst_76 = arith.constant dense<0xFF800000> : vector<4x8xf32>
    %258 = vector.multi_reduction <maximumf>, %257, %cst_76 [2] : vector<4x8x8xf32> to vector<4x8xf32>
    %259 = vector.shape_cast %258 : vector<4x8xf32> to vector<4x8x1xf32>
    %260 = vector.broadcast %259 : vector<4x8x1xf32> to vector<4x8x8xf32>
    %261 = arith.subf %257, %260 : vector<4x8x8xf32>
    %262 = math.exp %261 : vector<4x8x8xf32>
    %cst_77 = arith.constant dense<0.000000e+00> : vector<4x8xf32>
    %263 = vector.multi_reduction <add>, %262, %cst_77 [2] : vector<4x8x8xf32> to vector<4x8xf32>
    %264 = vector.shape_cast %263 : vector<4x8xf32> to vector<4x8x1xf32>
    %265 = tpu.reciprocal %264 {approx = true} : vector<4x8x1xf32> -> vector<4x8x1xf32>
    %266 = vector.broadcast %265 : vector<4x8x1xf32> to vector<4x8x8xf32>
    %267 = arith.mulf %262, %266 : vector<4x8x8xf32>
    "tpu.trace_start"() <{level = 10 : i32, message = "hqk,hkd->hqd"}> : () -> ()
    %cst_78 = arith.constant dense<0.000000e+00> : vector<4x8x8xf32>
    %268 = tpu.matmul %267, %254, %cst_78 {dimension_numbers = #tpu.dot_dimension_numbers<[2], [1], [1], [2], [0, 0, 0, 1, 1, 2], [0], [0]>} : vector<4x8x8xf32>, vector<4x8x8xf32>, vector<4x8x8xf32> -> vector<4x8x8xf32>
    "tpu.trace_stop"() : () -> ()
    %269 = vector.extract_strided_slice %268 {offsets = [0, 0, 0], sizes = [1, 8, 8], strides = [1, 1, 1]} : vector<4x8x8xf32> to vector<1x8x8xf32>
    %270 = vector.shape_cast %269 : vector<1x8x8xf32> to vector<8x8xf32>
    %271 = vector.extract_strided_slice %268 {offsets = [1, 0, 0], sizes = [1, 8, 8], strides = [1, 1, 1]} : vector<4x8x8xf32> to vector<1x8x8xf32>
    %272 = vector.shape_cast %271 : vector<1x8x8xf32> to vector<8x8xf32>
    %273 = vector.extract_strided_slice %268 {offsets = [2, 0, 0], sizes = [1, 8, 8], strides = [1, 1, 1]} : vector<4x8x8xf32> to vector<1x8x8xf32>
    %274 = vector.shape_cast %273 : vector<1x8x8xf32> to vector<8x8xf32>
    %275 = vector.extract_strided_slice %268 {offsets = [3, 0, 0], sizes = [1, 8, 8], strides = [1, 1, 1]} : vector<4x8x8xf32> to vector<1x8x8xf32>
    %276 = vector.shape_cast %275 : vector<1x8x8xf32> to vector<8x8xf32>
    %277 = tpu.concatenate %270, %272, %274, %276 in 1 : vector<8x8xf32>, vector<8x8xf32>, vector<8x8xf32>, vector<8x8xf32> -> vector<8x32xf32>
    %278 = arith.truncf %277 : vector<8x32xf32> to vector<8x32xbf16>
    %c1_79 = arith.constant 1 : index
    %c0_80 = arith.constant 0 : index
    %c0_81 = arith.constant 0 : index
    %279 = vector.load %arg7[%c1_79, %c0_80, %c0_81] : memref<2x32x32xbf16, #tpu.memory_space<vmem>>, vector<1x32x32xbf16>
    %280 = vector.shape_cast %279 : vector<1x32x32xbf16> to vector<32x32xbf16>
    %cst_82 = arith.constant dense<0.000000e+00> : vector<8x32xf32>
    %281 = tpu.matmul %278, %280, %cst_82 {dimension_numbers = #tpu.dot_dimension_numbers<[1], [0], [0], [1], [0, 0, 1, 1], [], []>} : vector<8x32xbf16>, vector<32x32xbf16>, vector<8x32xf32> -> vector<8x32xf32>
    %c1_83 = arith.constant 1 : index
    %c0_84 = arith.constant 0 : index
    %282 = vector.load %arg8[%c1_83, %c0_84] : memref<2x32xf32, #tpu.memory_space<vmem>>, vector<1x32xf32>
    %283 = vector.shape_cast %282 : vector<1x32xf32> to vector<32xf32>
    %284 = vector.shape_cast %283 : vector<32xf32> to vector<1x32xf32>
    %285 = vector.broadcast %284 : vector<1x32xf32> to vector<8x32xf32>
    %286 = arith.addf %281, %285 : vector<8x32xf32>
    %287 = arith.addf %185, %286 : vector<8x32xf32>
    %c1_85 = arith.constant 1 : index
    %c0_86 = arith.constant 0 : index
    %288 = vector.load %arg9[%c1_85, %c0_86] : memref<2x32xf32, #tpu.memory_space<vmem>>, vector<1x32xf32>
    %289 = vector.shape_cast %288 : vector<1x32xf32> to vector<32xf32>
    %c1_87 = arith.constant 1 : index
    %c0_88 = arith.constant 0 : index
    %290 = vector.load %arg10[%c1_87, %c0_88] : memref<2x32xf32, #tpu.memory_space<vmem>>, vector<1x32xf32>
    %291 = vector.shape_cast %290 : vector<1x32xf32> to vector<32xf32>
    %cst_89 = arith.constant dense<0.000000e+00> : vector<8xf32>
    %292 = vector.multi_reduction <add>, %287, %cst_89 [1] : vector<8x32xf32> to vector<8xf32>
    %293 = vector.shape_cast %292 : vector<8xf32> to vector<8x1xf32>
    %cst_90 = arith.constant 3.200000e+01 : f32
    %294 = vector.broadcast %cst_90 : f32 to vector<8x1xf32>
    %295 = arith.divf %293, %294 : vector<8x1xf32>
    %296 = vector.broadcast %295 : vector<8x1xf32> to vector<8x32xf32>
    %297 = arith.subf %287, %296 : vector<8x32xf32>
    %298 = arith.mulf %297, %297 : vector<8x32xf32>
    %cst_91 = arith.constant dense<0.000000e+00> : vector<8xf32>
    %299 = vector.multi_reduction <add>, %298, %cst_91 [1] : vector<8x32xf32> to vector<8xf32>
    %300 = vector.shape_cast %299 : vector<8xf32> to vector<8x1xf32>
    %cst_92 = arith.constant 3.200000e+01 : f32
    %301 = vector.broadcast %cst_92 : f32 to vector<8x1xf32>
    %302 = arith.divf %300, %301 : vector<8x1xf32>
    %303 = vector.broadcast %295 : vector<8x1xf32> to vector<8x32xf32>
    %304 = arith.subf %287, %303 : vector<8x32xf32>
    %cst_93 = arith.constant 9.99999974E-6 : f32
    %305 = vector.broadcast %cst_93 : f32 to vector<8x1xf32>
    %306 = arith.addf %302, %305 : vector<8x1xf32>
    %307 = math.rsqrt %306 : vector<8x1xf32>
    %308 = vector.broadcast %307 : vector<8x1xf32> to vector<8x32xf32>
    %309 = arith.mulf %304, %308 : vector<8x32xf32>
    %310 = vector.shape_cast %289 : vector<32xf32> to vector<1x32xf32>
    %311 = vector.broadcast %310 : vector<1x32xf32> to vector<8x32xf32>
    %312 = arith.mulf %309, %311 : vector<8x32xf32>
    %313 = vector.shape_cast %291 : vector<32xf32> to vector<1x32xf32>
    %314 = vector.broadcast %313 : vector<1x32xf32> to vector<8x32xf32>
    %315 = arith.addf %312, %314 : vector<8x32xf32>
    %316 = arith.truncf %315 : vector<8x32xf32> to vector<8x32xbf16>
    %c1_94 = arith.constant 1 : index
    %c0_95 = arith.constant 0 : index
    %c0_96 = arith.constant 0 : index
    %317 = vector.load %arg11[%c1_94, %c0_95, %c0_96] : memref<2x32x128xbf16, #tpu.memory_space<vmem>>, vector<1x32x128xbf16>
    %318 = vector.shape_cast %317 : vector<1x32x128xbf16> to vector<32x128xbf16>
    %cst_97 = arith.constant dense<0.000000e+00> : vector<8x128xf32>
    %319 = tpu.matmul %316, %318, %cst_97 {dimension_numbers = #tpu.dot_dimension_numbers<[1], [0], [0], [1], [0, 0, 1, 1], [], []>} : vector<8x32xbf16>, vector<32x128xbf16>, vector<8x128xf32> -> vector<8x128xf32>
    %c1_98 = arith.constant 1 : index
    %c0_99 = arith.constant 0 : index
    %320 = vector.load %arg12[%c1_98, %c0_99] : memref<2x128xf32, #tpu.memory_space<vmem>>, vector<1x128xf32>
    %321 = vector.shape_cast %320 : vector<1x128xf32> to vector<128xf32>
    %322 = vector.shape_cast %321 : vector<128xf32> to vector<1x128xf32>
    %323 = vector.broadcast %322 : vector<1x128xf32> to vector<8x128xf32>
    %324 = arith.addf %319, %323 : vector<8x128xf32>
    %325 = arith.mulf %324, %324 : vector<8x128xf32>
    %326 = arith.mulf %324, %325 : vector<8x128xf32>
    %cst_100 = arith.constant 4.471500e-02 : f32
    %327 = vector.broadcast %cst_100 : f32 to vector<8x128xf32>
    %328 = arith.mulf %327, %326 : vector<8x128xf32>
    %329 = arith.addf %324, %328 : vector<8x128xf32>
    %cst_101 = arith.constant 0.797884583 : f32
    %330 = vector.broadcast %cst_101 : f32 to vector<8x128xf32>
    %331 = arith.mulf %330, %329 : vector<8x128xf32>
    %332 = math.tanh %331 : vector<8x128xf32>
    %cst_102 = arith.constant 1.000000e+00 : f32
    %333 = vector.broadcast %cst_102 : f32 to vector<8x128xf32>
    %334 = arith.addf %333, %332 : vector<8x128xf32>
    %cst_103 = arith.constant 5.000000e-01 : f32
    %335 = vector.broadcast %cst_103 : f32 to vector<8x128xf32>
    %336 = arith.mulf %335, %334 : vector<8x128xf32>
    %337 = arith.mulf %324, %336 : vector<8x128xf32>
    %338 = arith.truncf %337 : vector<8x128xf32> to vector<8x128xbf16>
    %c1_104 = arith.constant 1 : index
    %c0_105 = arith.constant 0 : index
    %c0_106 = arith.constant 0 : index
    %339 = vector.load %arg13[%c1_104, %c0_105, %c0_106] : memref<2x128x32xbf16, #tpu.memory_space<vmem>>, vector<1x128x32xbf16>
    %340 = vector.shape_cast %339 : vector<1x128x32xbf16> to vector<128x32xbf16>
    %cst_107 = arith.constant dense<0.000000e+00> : vector<8x32xf32>
    %341 = tpu.matmul %338, %340, %cst_107 {dimension_numbers = #tpu.dot_dimension_numbers<[1], [0], [0], [1], [0, 0, 1, 1], [], []>} : vector<8x128xbf16>, vector<128x32xbf16>, vector<8x32xf32> -> vector<8x32xf32>
    %c1_108 = arith.constant 1 : index
    %c0_109 = arith.constant 0 : index
    %342 = vector.load %arg14[%c1_108, %c0_109] : memref<2x32xf32, #tpu.memory_space<vmem>>, vector<1x32xf32>
    %343 = vector.shape_cast %342 : vector<1x32xf32> to vector<32xf32>
    %344 = vector.shape_cast %343 : vector<32xf32> to vector<1x32xf32>
    %345 = vector.broadcast %344 : vector<1x32xf32> to vector<8x32xf32>
    %346 = arith.addf %341, %345 : vector<8x32xf32>
    %347 = arith.addf %287, %346 : vector<8x32xf32>
    %348 = arith.truncf %347 : vector<8x32xf32> to vector<8x32xbf16>
    %c0_110 = arith.constant 0 : index
    %c0_111 = arith.constant 0 : index
    %349 = vector.load %arg15[%c0_110, %c0_111] : memref<32x512xbf16, #tpu.memory_space<vmem>>, vector<32x512xbf16>
    %cst_112 = arith.constant dense<0.000000e+00> : vector<8x512xf32>
    %350 = tpu.matmul %348, %349, %cst_112 {dimension_numbers = #tpu.dot_dimension_numbers<[1], [0], [0], [1], [0, 0, 1, 1], [], []>} : vector<8x32xbf16>, vector<32x512xbf16>, vector<8x512xf32> -> vector<8x512xf32>
    %c0_113 = arith.constant 0 : index
    %c0_114 = arith.constant 0 : index
    %351 = vector.load %arg16[%c0_113, %c0_114] : memref<1x512xf32, #tpu.memory_space<vmem>>, vector<1x512xf32>
    %352 = vector.broadcast %351 : vector<1x512xf32> to vector<8x512xf32>
    %353 = arith.addf %350, %352 : vector<8x512xf32>
    %c0_115 = arith.constant 0 : index
    %c0_116 = arith.constant 0 : index
    %354 = vector.load %arg17[%c0_115, %c0_116] : memref<8x512xf32, #tpu.memory_space<vmem>>, vector<8x512xf32>
    tpu.vector_store %arg17[%c0_115, %c0_116], %353 {strides = array<i32>} : memref<8x512xf32, #tpu.memory_space<vmem>>, vector<8x512xf32>,
    return
  }
  func.func @transform_0(%arg0: i32) -> (i32, i32, i32) {
    %c0_i32 = arith.constant 0 : i32
    %c0_i32_0 = arith.constant 0 : i32
    %c0_i32_1 = arith.constant 0 : i32
    return %arg0, %c0_i32, %c0_i32_0 : i32, i32, i32
  }
  func.func @transform_1(%arg0: i32) -> (i32, i32) {
    %c0_i32 = arith.constant 0 : i32
    %c0_i32_0 = arith.constant 0 : i32
    return %arg0, %c0_i32 : i32, i32
  }
  func.func @transform_2(%arg0: i32) -> (i32, i32) {
    %c0_i32 = arith.constant 0 : i32
    %c0_i32_0 = arith.constant 0 : i32
    %c0_i32_1 = arith.constant 0 : i32
    return %c0_i32, %c0_i32_0 : i32, i32
  }
  func.func @transform_3(%arg0: i32) -> (i32, i32) {
    %c0_i32 = arith.constant 0 : i32
    %c0_i32_0 = arith.constant 0 : i32
    %c0_i32_1 = arith.constant 0 : i32
    return %c0_i32, %c0_i32_0 : i32, i32
  }
  func.func @transform_4(%arg0: i32) -> (i32, i32, i32) {
    %c0_i32 = arith.constant 0 : i32
    %c0_i32_0 = arith.constant 0 : i32
    %c0_i32_1 = arith.constant 0 : i32
    %c0_i32_2 = arith.constant 0 : i32
    return %c0_i32, %c0_i32_0, %c0_i32_1 : i32, i32, i32
  }
  func.func @transform_5(%arg0: i32) -> (i32, i32) {
    %c0_i32 = arith.constant 0 : i32
    %c0_i32_0 = arith.constant 0 : i32
    %c0_i32_1 = arith.constant 0 : i32
    return %c0_i32, %c0_i32_0 : i32, i32
  }
  func.func @transform_6(%arg0: i32) -> (i32, i32, i32) {
    %c0_i32 = arith.constant 0 : i32
    %c0_i32_0 = arith.constant 0 : i32
    %c0_i32_1 = arith.constant 0 : i32
    %c0_i32_2 = arith.constant 0 : i32
    return %c0_i32, %c0_i32_0, %c0_i32_1 : i32, i32, i32
  }
  func.func @transform_7(%arg0: i32) -> (i32, i32) {
    %c0_i32 = arith.constant 0 : i32
    %c0_i32_0 = arith.constant 0 : i32
    %c0_i32_1 = arith.constant 0 : i32
    return %c0_i32, %c0_i32_0 : i32, i32
  }
  func.func @transform_8(%arg0: i32) -> (i32, i32) {
    %c0_i32 = arith.constant 0 : i32
    %c0_i32_0 = arith.constant 0 : i32
    %c0_i32_1 = arith.constant 0 : i32
    return %c0_i32, %c0_i32_0 : i32, i32
  }
  func.func @transform_9(%arg0: i32) -> (i32, i32) {
    %c0_i32 = arith.constant 0 : i32
    %c0_i32_0 = arith.constant 0 : i32
    %c0_i32_1 = arith.constant 0 : i32
    return %c0_i32, %c0_i32_0 : i32, i32
  }
  func.func @transform_10(%arg0: i32) -> (i32, i32, i32) {
    %c0_i32 = arith.constant 0 : i32
    %c0_i32_0 = arith.constant 0 : i32
    %c0_i32_1 = arith.constant 0 : i32
    %c0_i32_2 = arith.constant 0 : i32
    return %c0_i32, %c0_i32_0, %c0_i32_1 : i32, i32, i32
  }
  func.func @transform_11(%arg0: i32) -> (i32, i32) {
    %c0_i32 = arith.constant 0 : i32
    %c0_i32_0 = arith.constant 0 : i32
    %c0_i32_1 = arith.constant 0 : i32
    return %c0_i32, %c0_i32_0 : i32, i32
  }
  func.func @transform_12(%arg0: i32) -> (i32, i32, i32) {
    %c0_i32 = arith.constant 0 : i32
    %c0_i32_0 = arith.constant 0 : i32
    %c0_i32_1 = arith.constant 0 : i32
    %c0_i32_2 = arith.constant 0 : i32
    return %c0_i32, %c0_i32_0, %c0_i32_1 : i32, i32, i32
  }
  func.func @transform_13(%arg0: i32) -> (i32, i32) {
    %c0_i32 = arith.constant 0 : i32
    %c0_i32_0 = arith.constant 0 : i32
    %c0_i32_1 = arith.constant 0 : i32
    return %c0_i32, %c0_i32_0 : i32, i32
  }
  func.func @transform_14(%arg0: i32) -> (i32, i32) {
    %c0_i32 = arith.constant 0 : i32
    %c0_i32_0 = arith.constant 0 : i32
    %c0_i32_1 = arith.constant 0 : i32
    return %c0_i32, %c0_i32_0 : i32, i32
  }
  func.func @transform_15(%arg0: i32) -> (i32, i32) {
    %c0_i32 = arith.constant 0 : i32
    %c0_i32_0 = arith.constant 0 : i32
    %c0_i32_1 = arith.constant 0 : i32
    return %c0_i32, %c0_i32_0 : i32, i32
  }
  func.func @transform_16(%arg0: i32) -> (i32, i32) {
    %c0_i32 = arith.constant 0 : i32
    %c0_i32_0 = arith.constant 0 : i32
    return %arg0, %c0_i32 : i32, i32
  }
}

</mosaic_0001>

<bundles_post_ra>
// kernel: tpu_custom_call.1
= control target key start
LH: loop header
LB: loop body
LE: loop exit
PB: predicated region body
PF: predicated region fallthrough
CT: control target
= control target key end

     0   :  { %s4606_s0 = inlined_call_operand.hbm [shape: f32[2,1,8], index: 0, kind: input, shape index: {}]   ;;  %s4607_s1 = inlined_call_operand.hbm [shape: f32[16,32], index: 1, kind: input, shape index: {}]   ;;  %s4608_s2 = inlined_call_operand.vmem [shape: f32[2,32], index: 2, kind: input, shape index: {}]   ;;  %s4609_s3 = inlined_call_operand.vmem [shape: f32[2,32], index: 3, kind: input, shape index: {}]   ;;  %s4610_s4 = inlined_call_operand.vmem [shape: bf16[2,32,96], index: 4, kind: input, shape index: {}]   ;;  %s4611_s5 = inlined_call_operand.vmem [shape: f32[2,96], index: 5, kind: input, shape index: {}]   ;;  %s4612_s6 = inlined_call_operand.vmem [shape: bf16[2,32,32], index: 6, kind: input, shape index: {}]   ;;  %s4613_s7 = inlined_call_operand.vmem [shape: f32[2,32], index: 7, kind: input, shape index: {}]   ;;  %s4614_s8 = inlined_call_operand.hbm [shape: f32[2,32], index: 8, kind: input, shape index: {}]   ;;  %s4615_s9 = inlined_call_operand.hbm [shape: f32[2,32], index: 9, kind: input, shape index: {}]   ;;  %s4616_s10 = inlined_call_operand.vmem [shape: bf16[2,32,128], index: 10, kind: input, shape index: {}]   ;;  %s4617_s11 = inlined_call_operand.hbm [shape: f32[2,128], index: 11, kind: input, shape index: {}]   ;;  %s4618_s12 = inlined_call_operand.vmem [shape: bf16[2,128,32], index: 12, kind: input, shape index: {}]   ;;  %s4619_s13 = inlined_call_operand.vmem [shape: f32[2,32], index: 13, kind: input, shape index: {}]   ;;  %s4620_s14 = inlined_call_operand.vmem [shape: bf16[32,512], index: 14, kind: input, shape index: {}]   ;;  %s4621_s15 = inlined_call_operand.vmem [shape: f32[1,512], index: 15, kind: input, shape index: {}]   ;;  %s4622_s16 = inlined_call_operand.hbm [shape: f32[16,512], index: 16, kind: output, shape index: {}]  }
   0x1   :  { %4636 = sst [smem:[#allocation20_spill]] %s4606_s0 }
   0x2   :  { %4637 = sst [smem:[#allocation21_spill]] %s4614_s8 }
   0x3   :  { %4638 = sst [smem:[#allocation22_spill]] %s4615_s9 }
   0x4   :  { %4639 = sst [smem:[#allocation23_spill]] %s4617_s11 }
   0x5   :  { %4640 = sst [smem:[#allocation24_spill]] %s4618_s12 }
   0x6   :  { %4641 = sst [smem:[#allocation25_spill]] %s4619_s13 }
   0x7   :  { %4642 = sst [smem:[#allocation26_spill]] %s4620_s14 }
   0x8   :  { %4643 = sst [smem:[#allocation27_spill]] %s4621_s15 }
   0x9   :  { %4644 = sst [smem:[#allocation28_spill]] %s4622_s16 }
   0xa   :  { %21 = vsyncpa [#allocation3], 0 }
   0xb   :  { %23 = vsyncpa [#allocation3 + $0x1], 0 }
   0xc   :  { %24 = vsyncpa [#allocation6], 0 }
   0xd   :  { %26 = vsyncpa [#allocation6 + $0x1], 0 }
   0xe   :  { %27 = vsyncpa [#allocation9], 0 }
   0xf   :  { %28 = vsyncpa [#allocation4], 0 }
  0x10   :  { %30 = vsyncpa [#allocation4 + $0x1], 0  ;;  %s3909_s21 = smov 0   ;;  %s3911_s22 = smov 0  }
  0x11   :  { %s3913_s23 = smov 0   ;;  %s3915_s24 = smov 0  }
  0x12 LB: > { %4645 = sst [smem:[#allocation17_spill]] %s3792_s21  ;;  %s3930_s25 = sadd.s32 4294967295, %s3804_s24   ;;  %s3804_s24 = sphi %s3915_s24, %s4683_s24   ;;  %s3800_s23 = sphi %s3913_s23, %s4682_s23   ;;  %s3796_s22 = sphi %s3911_s22, %s4681_s22   ;;  %s3792_s21 = sphi %s3909_s21, %s4680_s21  }
  0x13   : > { %s3034_s26 = sadd.s32 4294967294, %s3804_s24   ;;  %p56_p0 = scmp.ne.s32.totalorder %s3796_s22, %s3792_s21 }
  0x14   : > { %p4628_p1 = scmp.eq.s32.totalorder %s3930_s25, 0  ;;  %p406_p3 = scmp.eq.s32.totalorder %s3034_s26, 1 }
  0x15   : > { %p3035_p5 = scmp.ge.s32.totalorder %s3804_s24, 1  ;;  %p413_p7 = scmp.lt.s32.totalorder %s3804_s24, 3 }
  0x16   : > { %p3939_p4 = por %p4628_p1, %p56_p0  ;;  %p3944_p6 = por %p406_p3, %p56_p0 }
  0x17   : > { %p3949_p8 = pnand %p3035_p5, %p413_p7  ;;  %s3806_s30 = smov [#allocation7]  }
  0x18   : > { %s4646_s27 = scalar_select %p3939_p4, 1, 0 }
  0x19   : > { %s4647_s28 = scalar_select %p3944_p6, 1, 0 }
  0x1a   : > { %s4649_s29 = scalar_select %p3949_p8, 1, 0 }
  0x1b   : > { %4648 = sst [smem:[#allocation18_spill]] %s4647_s28  ;;  %s444_s0 = sshll.u32 %s3806_s30, 4  ;;  %s445_s0 = int_to_ptr.vmem [resolvable:$true] %s444_s0 }
  0x1c   : > { %p3422_p10 = pneg %p3949_p8  ;;  %s3807_s17 = smov [#allocation8]  }
  0x1d   : > { %s455_s18 = sshll.u32 %s3807_s17, 4  ;;  %s3808_s20 = smov [#allocation10]   ;;  %s3962_s18 = int_to_ptr.vmem [resolvable:$true] %s455_s18 }
  0x1e   : > { %p3958_p11 = pnand %p3422_p10, %p4628_p1  ;;  %s469_s26 = sshll.u32 %s3808_s20, 4  ;;  %s3964_s26 = int_to_ptr.vmem [resolvable:$true] %s469_s26 }
  0x1f   : > { %s4651_s8 = sld [smem:[#allocation21_spill]] }
  0x20   : > { %p3974_p13 = pneg %p3958_p11 }
  0x25   : > { %s3582_s21 = scalar_lea.hbm %s4651_s8, 32 }
  0x26   : > { %p3583_p12 = scmp.ne.s32.totalorder %s4651_s8, %s3582_s21  ;;  %p3589_p5 = scmp.lt.u32.totalorder %s3582_s21, %s4651_s8 }
  0x28   : > { %p3585_p0 = pnand %p3974_p13, %p3583_p12 }
  0x2a   : > { %p3586_p3 = pneg %p3585_p0 }
  0x2c   : > { %p3591_p7 = pnand %p3589_p5, %p3586_p3 }
  0x2e   : > { %3594 = shalt.err (!%p3591_p7)
}
  0x2f   : > { %s3595_s28 = scalar_lea.vmem %s445_s0, 32  ;;  %p3603_p2 = scmp.lt.s32.totalorder %s445_s0, %s445_s0 }
  0x30   : > { %p3596_p10 = scmp.ne.s32.totalorder %s445_s0, %s3595_s28  ;;  %p3604_p6 = scmp.lt.s32.totalorder %s3595_s28, %s3595_s28 }
  0x32   : > { %p3598_p9 = pnand %p3596_p10, %p3974_p13  ;;  %p3605_p4 = por %p3604_p6, %p3603_p2 }
  0x34   : > { %p3599_p1 = pneg %p3598_p9 }
  0x36   : > { %p3606_p8 = pnand %p3605_p4, %p3599_p1 }
  0x38   : > { %3609 = shalt.err (!%p3606_p8)
}
  0x39   : > { %3425 = dma.hbm_to_vmem [thread:$0]  (!%p3958_p11), %s4651_s8, 32, %s445_s0, [#allocation6]  }
  0x3a   : > { %s4653_s9 = sld [smem:[#allocation22_spill]] }
  0x40   : > { %s3610_s30 = scalar_lea.hbm %s4653_s9, 32 }
  0x41   : > { %p3611_p9 = scmp.ne.s32.totalorder %s4653_s9, %s3610_s30  ;;  %p3617_p1 = scmp.lt.u32.totalorder %s3610_s30, %s4653_s9 }
  0x43   : > { %p3613_p12 = pnand %p3611_p9, %p3974_p13 }
  0x45   : > { %p3614_p2 = pneg %p3613_p12 }
  0x47   : > { %p3619_p4 = pnand %p3617_p1, %p3614_p2 }
  0x49   : > { %3622 = shalt.err (!%p3619_p4)
}
  0x4a   : > { %s3623_s0 = scalar_lea.vmem %s3962_s18, 32  ;;  %p3631_p3 = scmp.lt.s32.totalorder %s3962_s18, %s3962_s18 }
  0x4b   : > { %p3624_p6 = scmp.ne.s32.totalorder %s3962_s18, %s3623_s0  ;;  %p3632_p5 = scmp.lt.s32.totalorder %s3623_s0, %s3623_s0 }
  0x4d   : > { %p3626_p8 = pnand %p3624_p6, %p3974_p13  ;;  %p3633_p7 = por %p3632_p5, %p3631_p3 }
  0x4f   : > { %p3627_p0 = pneg %p3626_p8 }
  0x51   : > { %p3634_p10 = pnand %p3633_p7, %p3627_p0 }
  0x53   : > { %3637 = shalt.err (!%p3634_p10)
}
  0x54   : > { %3428 = dma.hbm_to_vmem [thread:$0]  (!%p3958_p11), %s4653_s9, 32, %s3962_s18, [#allocation9]  }
  0x55   : > { %s4654_s11 = sld [smem:[#allocation23_spill]] }
  0x5b   : > { %s3638_s14 = scalar_lea.hbm %s4654_s11, 32 }
  0x5c   : > { %p3639_p9 = scmp.ne.s32.totalorder %s4654_s11, %s3638_s14  ;;  %p3645_p1 = scmp.lt.u32.totalorder %s3638_s14, %s4654_s11 }
  0x5e   : > { %p3641_p12 = pnand %p3639_p9, %p3974_p13 }
  0x60   : > { %p3642_p2 = pneg %p3641_p12 }
  0x62   : > { %p3647_p4 = pnand %p3645_p1, %p3642_p2 }
  0x64   : > { %3650 = shalt.err (!%p3647_p4)
}
  0x65   : > { %s3651_s18 = scalar_lea.vmem %s3964_s26, 32  ;;  %p3659_p3 = scmp.lt.s32.totalorder %s3964_s26, %s3964_s26 }
  0x66   : > { %p3652_p6 = scmp.ne.s32.totalorder %s3964_s26, %s3651_s18  ;;  %p3660_p5 = scmp.lt.s32.totalorder %s3651_s18, %s3651_s18 }
  0x68   : > { %p3654_p8 = pnand %p3652_p6, %p3974_p13  ;;  %p3661_p7 = por %p3660_p5, %p3659_p3 }
  0x6a   : > { %p3655_p0 = pneg %p3654_p8 }
  0x6c   : > { %p3662_p10 = pnand %p3661_p7, %p3655_p0 }
  0x6e   : > { %3665 = shalt.err (!%p3662_p10)
}
  0x6f   : > { %3431 = dma.hbm_to_vmem [thread:$0]  (!%p3958_p11), %s4654_s11, 32, %s3964_s26, [#allocation9]  }
  0x70   : > { %s4037_s17 = sadd.s32 1, %s3804_s24   ;;  %s43_s13 = sadd.s32 1, %s3800_s23 }
  0x71   : > { %s40_s19 = ssub.s32 %s3804_s24, %s4037_s17  ;;  %p50_p9 = scmp.ne.s32.totalorder %s3800_s23, %s3796_s22 }
  0x72   : > { %p41_p13 = scmp.eq.s32.totalorder %s40_s19, 0  ;;  %p51_p12 = scmp.eq.s32.totalorder %s3804_s24, 0 }
  0x73   : > { %p3446_p2 = scmp.lt.s32.totalorder %s3804_s24, 2  ;;  %p4656_p4 = scmp.eq.s32.totalorder %s3930_s25, 1 }
  0x74   : > { %s4047_s15 = scalar_select %p41_p13, %s3800_s23, %s43_s13  }
  0x75   : > { %p52_p1 = por %p51_p12, %p50_p9  ;;  %p4051_p6 = por %p4656_p4, %p50_p9 }
  0x76   : > { %4655 = sst [smem:[#allocation19_spill]] %s4047_s15  ;;  %s4056_s14 = sand.u32 1, %s3800_s23  }
  0x77   : > { %s4657_s16 = scalar_select %p4051_p6, 1, 0 }
  0x78   : > { %s3040_s26 = sshll.u32 %s3804_s24, 4  ;;  %s4658_s20 = sld [smem:[#allocation20_spill]] }
  0x79   : > { %s495_s18 = scalar_lea.vmem [#allocation2], %s4056_s14  ;;  %p4067_p11 = pnand %p3446_p2, %p52_p1 }
  0x7a   : > { %s502_s0 = sshll.u32 %s495_s18, 4  ;;  %s3041_s13 = sshll.u32 %s4056_s14, 3  ;;  %s4065_s0 = int_to_ptr.vmem [resolvable:$true] %s502_s0 }
  0x7b   : > { %s493_s8 = scalar_lea.sflag [#allocation3], %s4056_s14  ;;  %p3668_p0 = pneg %p4067_p11 }
  0x7e   : > { %s4062_s28 = scalar_lea.hbm %s4658_s20, %s3040_s26  ;;  %s3671_s18 = scalar_lea.hbm %s4658_s20, 32 }
  0x7f   : > { %s3666_s21 = scalar_lea.hbm %s4062_s28, 16  ;;  %p3672_p7 = scmp.lt.u32.totalorder %s4062_s28, %s4658_s20 }
  0x80   : > { %p3667_p8 = scmp.ne.s32.totalorder %s4062_s28, %s3666_s21  ;;  %p3673_p10 = scmp.lt.u32.totalorder %s3671_s18, %s3666_s21 }
  0x81   : > { %p3675_p9 = scmp.lt.u32.totalorder %s3666_s21, %s4062_s28 }
  0x82   : > { %p3669_p3 = pnand %p3668_p0, %p3667_p8  ;;  %p3674_p13 = por %p3673_p10, %p3672_p7 }
  0x84   : > { %p3670_p5 = pneg %p3669_p3  ;;  %p3676_p12 = por %p3675_p9, %p3674_p13 }
  0x86   : > { %p3677_p2 = pnand %p3676_p12, %p3670_p5 }
  0x88   : > { %3680 = shalt.err (!%p3677_p2)
}
  0x89   : > { %s3681_s19 = scalar_lea.vmem %s4065_s0, 16  ;;  %s3809_s26 = smov [#allocation2]  }
  0x8a   : > { %p3682_p1 = scmp.ne.s32.totalorder %s4065_s0, %s3681_s19  ;;  %s3686_s30 = sshll.u32 %s3809_s26, 4  ;;  %s3687_s30 = int_to_ptr.vmem [resolvable:$false] %s3686_s30 }
  0x8b   : > { %s3688_s9 = scalar_lea.vmem %s3687_s30, 32  ;;  %p3689_p3 = scmp.lt.s32.totalorder %s4065_s0, %s3687_s30 }
  0x8c   : > { %p3684_p4 = pnand %p3682_p1, %p3668_p0  ;;  %p3690_p7 = scmp.lt.s32.totalorder %s3688_s9, %s3681_s19 }
  0x8e   : > { %p3685_p8 = pneg %p3684_p4  ;;  %p3691_p10 = por %p3690_p7, %p3689_p3 }
  0x90   : > { %p3692_p13 = pnand %p3691_p10, %p3685_p8 }
  0x92   : > { %3695 = shalt.err (!%p3692_p13)
}
  0x93   : > { %3435 = dma.hbm_to_vmem [thread:$0]  (!%p4067_p11), %s4062_s28, 16, %s4065_s0, %s493_s8  }
  0x94   : > { %s3042_s11 = sshll.u32 %s3804_s24, 7  ;;  %s513_s19 = scalar_lea.vmem [#allocation5], %s3041_s13 }
  0x95   : > { %s4103_s26 = scalar_lea.hbm %s4607_s1, %s3042_s11  ;;  %s520_s30 = sshll.u32 %s513_s19, 4  ;;  %s521_s30 = int_to_ptr.vmem [resolvable:$true] %s520_s30 }
  0x96   : > { %s4660_s9 = sand.u32 1, %s3804_s24   ;;  %s3696_s15 = scalar_lea.hbm %s4103_s26, 128 }
  0x97   : > { %s510_s20 = scalar_lea.sflag [#allocation6], %s4660_s9  ;;  %p3697_p5 = scmp.ne.s32.totalorder %s4103_s26, %s3696_s15 }
  0x98   : > { %s3701_s0 = scalar_lea.hbm %s4607_s1, 256  ;;  %p3702_p2 = scmp.lt.u32.totalorder %s4103_s26, %s4607_s1 }
  0x99   : > { %p3699_p9 = pnand %p3697_p5, %p3668_p0  ;;  %p3703_p1 = scmp.lt.u32.totalorder %s3701_s0, %s3696_s15 }
  0x9a   : > { %p3705_p8 = scmp.lt.u32.totalorder %s3696_s15, %s4103_s26 }
  0x9b   : > { %p3700_p12 = pneg %p3699_p9  ;;  %p3704_p4 = por %p3703_p1, %p3702_p2 }
  0x9d   : > { %p3706_p3 = por %p3705_p8, %p3704_p4 }
  0x9f   : > { %p3707_p7 = pnand %p3706_p3, %p3700_p12 }
  0xa1   : > { %3710 = shalt.err (!%p3707_p7)
}
  0xa2   : > { %s3711_s13 = scalar_lea.vmem %s521_s30, 128  ;;  %s3810_s21 = smov [#allocation5]  }
  0xa3   : > { %p3712_p10 = scmp.ne.s32.totalorder %s521_s30, %s3711_s13  ;;  %s3716_s18 = sshll.u32 %s3810_s21, 4  ;;  %s3717_s18 = int_to_ptr.vmem [resolvable:$false] %s3716_s18 }
  0xa4   : > { %s3718_s19 = scalar_lea.vmem %s3717_s18, 256  ;;  %p3719_p9 = scmp.lt.s32.totalorder %s521_s30, %s3717_s18 }
  0xa5   : > { %p3714_p13 = pnand %p3712_p10, %p3668_p0  ;;  %p3720_p6 = scmp.lt.s32.totalorder %s3718_s19, %s3711_s13 }
  0xa7   : > { %p3715_p5 = pneg %p3714_p13  ;;  %p3721_p1 = por %p3720_p6, %p3719_p9 }
  0xa9   : > { %p3722_p2 = pnand %p3721_p1, %p3715_p5 }
  0xab   : > { %3725 = shalt.err (!%p3722_p2)
}
  0xac   : > { %3438 = dma.hbm_to_vmem [thread:$0]  (!%p4067_p11), %s4103_s26, 128, %s521_s30, %s510_s20  }
  0xad   : > { %p4661_p12 = scmp.ne.s32.totalorder %s4649_s29, 0 }
  0xae   : > { %s4131_s15 = sand.u32 (!%p4661_p12), 1, %s3796_s22   ;;  %p4662_p0 = scmp.ne.s32.totalorder (!%p4661_p12), %s4646_s27, 0 }
  0xaf   : > { %529 = sbr.rel (%p4661_p12) target bundleno = 5673 (0x1629), region = 84  ;;  %s532_s9 = scalar_lea.sflag (!%p4661_p12), [#allocation3], %s4131_s15 }
  0xb0   : > { %s534_s8 = scalar_lea.vmem (!%p4661_p12), [#allocation2], %s4131_s15 }
  0xb6   : > { %3771 = dma.done.wait (%p4662_p0), %s532_s9, 16  }
  0xb7   : > { %3773 = vsyncadd (%p4662_p0), %s532_s9, 4294967280  ;;  %s539_s20 = sand.u32 1, %s3930_s25   ;;  %s3044_s12 = sshll.u32 %s4131_s15, 3 }
  0xb8   : > { %s540_s29 = scalar_lea.sflag [#allocation6], %s539_s20  ;;  %s543_s26 = scalar_lea.vmem [#allocation5], %s3044_s12 }
  0xb9   : > { %3775 = dma.done.wait (%p4662_p0), %s540_s29, 128  }
  0xba   : > { %3777 = vsyncadd (%p4662_p0), %s540_s29, 4294967168  ;;  %p4663_p6 = scmp.eq.s32.totalorder %s3930_s25, 0 }
  0xbc   : > { %3779 = dma.done.wait (%p4663_p6), [#allocation6], 32   ;;  %p4664_p11 = pmov %p4663_p6 }
  0xbd   : > { %p4665_p4 = pmov %p4663_p6 }
  0xbe   : > { %3781 = vsyncadd (%p4664_p11), [#allocation6], 4294967264 }
  0xbf   : > { %3783 = dma.done.wait (%p4665_p4), [#allocation9], 64   ;;  %p4666_p8 = pmov %p4665_p4 }
  0xc0   : > { %vm638_vm0 = vcmask 261120   ;;  %v4153_v0 = vld [vmem:[%s543_s26] sm:$0xff]  ;;  %v3811_v8 = vmov 0.0   ;;  %vm3812_vm1 = vmmov 0   ;;  %v3049_v14 = vld [vmem:[%s4608_s2] ss:$0 sm:$0xff]  ;;  %v610_v39 = vlaneseq }
  0xc1   : > { %3785 = vsyncadd (%p4666_p8), [#allocation9], 4294967232  ;;  %v639_v1 = vsel %vm638_vm0, %v4153_v0, 0.0  ;;  %v3498_v7 = vld [vmem:[%s4610_s4] sm:$0xff]   ;;  %3236 = vmatprep.subr.bf16.mxu0 %v3811_v8  ;;  %3240 = vmatprep.mubr.msk.bf16.mxu0 %vm3812_vm1, %v3811_v8  ;;  %v3499_v9 = vld [vmem:[%s4610_s4 + $0x8] sm:$0xff]   ;;  %s3813_s9 = smov 104  }
  0xc2   : > { %640 = vadd.xlane.f32.xlu0 %v639_v1  ;;  %3237 = vmatpush3.bf16.msra.mxu0 %v3498_v7  ;;  %v3050_v16 = vld [vmem:[%s4609_s3] ss:$0 sm:$0xff]  ;;  %s3814_s20 = smov 120   ;;  %s3815_s12 = smov 112   ;;  %vm745_vm2 = vcmask 64512   ;;  %v4233_v41 = vshrl.u32 %v610_v39, 7 }
  0xc3   : > { %3244 = vmatprep.subr.mxu1 %v3811_v8  ;;  %3238 = vmatprep.subr.bf16.mxu0 %v3811_v8  ;;  %v3051_v20 = vld [vmem:[%s4611_s5] ss:$0 sm:$0xff]  ;;  %s3816_s29 = smov 96   ;;  %v631_v42 = vand.u32 127, %v610_v39  ;;  %v3817_v44 = vmov -1e+30  }
  0xc4   : > { %3246 = vmatprep.mubr.msk.f32.mxu1 %vm3812_vm1, %v3811_v8  ;;  %v3167_v31 = vld [vmem:[%s534_s8] ss:$0 sm:$0xff]  ;;  %s3818_s8 = smov 64   ;;  %s3819_s0 = smov 8   ;;  %vm1409_vm6 = vcmask 130048   ;;  %vm1411_vm7 = vcmask 195584  }
  0xc5   : > { %vm632_vm4 = vcmp.le.s32.totalorder %v631_v42, %v4233_v41  ;;  %v3501_v42 = vld [vmem:[%s4612_s6 + $0x8] sm:$0xff]   ;;  %s3820_s14 = smov 16   ;;  %s4635_s11 = smov 24  }
  0xc6   : > { %3239 = vmatpush3.bf16.msra.mxu0 %v3499_v9  ;;  %v633_v45 = vsel %vm632_vm4, 0.0, %v3817_v44  ;;  %s4667_s13 = sld [smem:[#allocation24_spill]]  ;;  %s4668_s21 = sld [smem:[#allocation25_spill]] }
  0xc7   : > { %3259 = vmatprep.subr.mxu0 %v3811_v8  ;;  %s3048_s30 = sshll.u32 %s4131_s15, 5  ;;  %p4674_p7 = scmp.ne.s32.totalorder %s4657_s16, 0 }
  0xc8   : > { %s607_s28 = scalar_lea.vmem [#allocation11], %s3048_s30 }
  0xc9   : > { %s2916_s19 = sshll.u32 %s607_s28, 4  ;;  %s4564_s19 = int_to_ptr.vmem [resolvable:$true] %s2916_s19 }
  0xcc   : > { %s4669_s18 = smov %s4668_s21 }
 0x14f   : > { %v641_v2 = vpop.xlane.xlu0 %640 }
 0x150   : > { %v643_v3 = vmul.f32 0.03125, %v641_v2 }
 0x152   : > { %v644_v4 = vsub.f32 %v4153_v0, %v643_v3 }
 0x154   : > { %v645_v5 = vmul.f32 %v644_v4, %v644_v4 }
 0x156   : > { %v646_v6 = vsel %vm638_vm0, %v645_v5, 0.0 }
 0x157   : > { %647 = vadd.xlane.f32.xlu0 %v646_v6 }
 0x1e4   : > { %v648_v10 = vpop.xlane.xlu0 %647 }
 0x1e5   : > { %v649_v11 = vmul.f32 0.03125, %v648_v10 }
 0x1e7   : > { %v650_v12 = vadd.f32 1e-05, %v649_v11 }
 0x1e9   : > { %3538 = vrsqrt.f32 %v650_v12 }
 0x1f3   : > { %v3539_v13 = vpop.eup %3538 }
 0x1f4   : > { %v652_v15 = vmul.f32 %v3539_v13, %v644_v4 }
 0x1f6   : > { %v657_v17 = vmul.f32 %v3049_v14, %v652_v15 }
 0x1f8   : > { %v662_v18 = vadd.f32 %v3050_v16, %v657_v17 }
 0x1fa   : > { %v663_v19 = vpack.c.bf16 %v662_v18, %v662_v18 }
 0x1fc   : > { %3241 = vmatmul.mubr.msk.bf16.vlgmr.msra.gmra.mrb[0].mxu0 %vm638_vm0, %v663_v19 }
 0x1fd   : > { %3261 = vmatprep.mubr.msk.f32.mxu0 %vm3812_vm1, %v3811_v8 }
 0x2cf   : > { %v722_v21 = vpop.f32.mrb[0].mxu0 }
 0x2d0   : > { %v4185_v22 = vadd.f32 %v3051_v20, %v722_v21  ;;  %v3242_v23 = vpop.f32.mrb[1].mxu0 }
 0x2d1   : > { %v725_v24 = vpop.f32.mrb[2].mxu0 }
 0x2d2   : > { %741 = vrot.lane.b32.xlu0 %v4185_v22, %s3813_s9  ;;  %737 = vrot.lane.b32.xlu1 %v4185_v22, %s3814_s20  ;;  %v3243_v25 = vpop.f32.mrb[3].mxu0  ;;  %v728_v26 = vmul.f32 0.35355338, %v4185_v22 }
 0x2d6   : > { %739 = vrot.lane.b32.xlu1 %v4185_v22, %s3815_s12  ;;  %734 = vrot.lane.b32.xlu0 %v728_v26, %s3813_s9 }
 0x2da   : > { %743 = vrot.lane.b32.xlu1 %v4185_v22, %s3816_s29 }
 0x2de   : > { %730 = vrot.lane.b32.xlu1 %v728_v26, %s3814_s20 }
 0x344   : > { %v4198_v27 = vpop.permute.xlu1 %737  ;;  %v4206_v29 = vpop.permute.xlu0 %741 }
 0x345   : > { %820 = vrot.lane.b32.xlu1 %v4198_v27, %s3816_s29 }
 0x348   : > { %v4202_v28 = vpop.permute.xlu1 %739  ;;  %v735_v36 = vpop.permute.xlu0 %734 }
 0x349   : > { %896 = vrot.lane.b32.xlu1 %v4202_v28, %s3816_s29 }
 0x34c   : > { %v744_v30 = vpop.permute.xlu1 %743 }
 0x34d   : > { %3245 = vmatpush3.xpose.msk.msra.mxu1 %vm745_vm2, %v744_v30  ;;  %972 = vrot.lane.b32.xlu1 %v4206_v29, %s3816_s29 }
 0x34e   : > { %3249 = vmatprep.subr.mxu1 %v3811_v8 }
 0x350   : > { %3247 = vmatmul.mubr.msk.f32.vlgmr.msra.gmra.mrb[0].mxu1 %vm745_vm2, %v728_v26  ;;  %v731_v32 = vpop.permute.xlu1 %730 }
 0x351   : > { %732 = vrot.lane.b32.xlu1 %v728_v26, %s3815_s12  ;;  %3251 = vmatprep.mubr.msk.f32.mxu1 %vm3812_vm1, %v3811_v8 }
 0x355   : > { %615 = vbcast.lane.b32.xlu1 %v3167_v31, 256 }
 0x3b7   : > { %v821_v33 = vpop.permute.xlu1 %820 }
 0x3b8   : > { %3250 = vmatpush3.xpose.msk.msra.mxu1 %vm745_vm2, %v821_v33 }
 0x3b9   : > { %3254 = vmatprep.subr.mxu1 %v3811_v8 }
 0x3bb   : > { %v897_v34 = vpop.permute.xlu1 %896  ;;  %3252 = vmatmul.mubr.msk.f32.vlgmr.msra.gmra.mrb[2].mxu1 %vm745_vm2, %v731_v32 }
 0x3bc   : > { %3255 = vmatpush3.xpose.msk.msra.mxu1 %vm745_vm2, %v897_v34  ;;  %3256 = vmatprep.mubr.msk.f32.mxu1 %vm3812_vm1, %v3811_v8 }
 0x3bd   : > { %3264 = vmatprep.subr.mxu1 %v3811_v8 }
 0x3bf   : > { %v973_v35 = vpop.permute.xlu1 %972 }
 0x3c0   : > { %3260 = vmatpush3.xpose.msk.msra.mxu0 %vm745_vm2, %v973_v35 }
 0x3c1   : > { %3269 = vmatprep.subr.mxu0 %v3811_v8 }
 0x3c3   : > { %3262 = vmatmul.mubr.msk.f32.vlgmr.msra.gmra.mrb[4].mxu0 %vm745_vm2, %v735_v36  ;;  %v733_v37 = vpop.permute.xlu1 %732 }
 0x3c4   : > { %3257 = vmatmul.mubr.msk.f32.vlgmr.msra.gmra.mrb[4].mxu1 %vm745_vm2, %v733_v37  ;;  %3271 = vmatprep.mubr.msk.f32.mxu0 %vm3812_vm1, %v3811_v8 }
 0x3c5   : > { %3266 = vmatprep.mubr.msk.f32.mxu1 %vm3812_vm1, %v3811_v8 }
 0x3c7   : > { %v616_v38 = vpop.permute.xlu1 %615 }
 0x3c8   : > { %v623_v40 = vmul.f32 %v3167_v31, %v616_v38 }
 0x3ca   : > { %vm625_vm3 = vcmp.eq.f32.partialorder %v623_v40, 1.0  ;;  %vm624_vm5 = vcmp.eq.f32.partialorder %v623_v40, 0.0 }
 0x3cb   : > { %v626_v43 = vsel %vm625_vm3, 0.0, %v623_v40  ;;  %v3500_v40 = vld [vmem:[%s4612_s6] sm:$0xff]  }
 0x3cc   : > { %v627_v46 = vsel %vm624_vm5, -10000.0, %v626_v43 }
 0x3cd   : > { %v4236_v47 = vadd.f32 %v633_v45, %v627_v46 }
 0x423   : > { %v816_v48 = vpop.f32.mrb[0].mxu1 }
 0x424   : > { %v817_v49 = vadd.f32 %v816_v48, %v4236_v47  ;;  %v3248_v50 = vpop.f32.mrb[1].mxu1 }
 0x426   : > { %v1048_v51 = vsel %vm745_vm2, %v817_v49, -inf }
 0x427   : > { %1049 = vmax.xlane.f32.xlu0 %v1048_v51 }
 0x48e   : > { %v892_v52 = vpop.f32.mrb[2].mxu1 }
 0x48f   : > { %v893_v53 = vadd.f32 %v892_v52, %v4236_v47  ;;  %v3253_v54 = vpop.f32.mrb[3].mxu1 }
 0x491   : > { %v1051_v55 = vsel %vm745_vm2, %v893_v53, -inf }
 0x492   : > { %1052 = vmax.xlane.f32.xlu1 %v1051_v55 }
 0x496   : > { %v1044_v56 = vpop.f32.mrb[4].mxu0 }
 0x497   : > { %v968_v57 = vpop.f32.mrb[4].mxu1  ;;  %v3263_v58 = vpop.f32.mrb[5].mxu0  ;;  %v1045_v61 = vadd.f32 %v1044_v56, %v4236_v47 }
 0x498   : > { %v969_v59 = vadd.f32 %v968_v57, %v4236_v47  ;;  %v3258_v60 = vpop.f32.mrb[5].mxu1  ;;  %v3067_v57 = vld [vmem:[%s4613_s7] ss:$0 sm:$0xff] }
 0x499   : > { %v1057_v63 = vsel %vm745_vm2, %v1045_v61, -inf }
 0x49a   : > { %v1054_v62 = vsel %vm745_vm2, %v969_v59, -inf }
 0x49b   : > { %1055 = vmax.xlane.f32.xlu0 %v1054_v62 }
 0x49f   : > { %1058 = vmax.xlane.f32.xlu0 %v1057_v63 }
 0x4a3   : > { %1092 = vrot.lane.b32.xlu1 %v4185_v22, %s3818_s8 }
 0x4b4   : > { %v1050_v1 = vpop.xlane.xlu0 %1049 }
 0x4b5   : > { %v1060_v2 = vsub.f32 %v817_v49, %v1050_v1 }
 0x4b7   : > { %v1064_v3 = vmul.f32 1.442695, %v1060_v2 }
 0x4b9   : > { %3540 = vpow2.f32 %v1064_v3 }
 0x4c3   : > { %v3541_v4 = vpop.eup %3540 }
 0x4c4   : > { %v1072_v5 = vsel %vm745_vm2, %v3541_v4, 0.0 }
 0x4c7   : > { %1073 = vadd.xlane.f32.xlu1 %v1072_v5 }
 0x4d8   : > { %1244 = vrot.lane.b32.xlu1 %v4202_v28, %s3818_s8 }
 0x51f   : > { %v1053_v6 = vpop.xlane.xlu1 %1052 }
 0x520   : > { %v1061_v7 = vsub.f32 %v893_v53, %v1053_v6 }
 0x522   : > { %v1066_v9 = vmul.f32 1.442695, %v1061_v7  ;;  %v3502_v7 = vld [vmem:[%s4616_s10] sm:$0xff]  }
 0x523   : > { %v1093_v10 = vpop.permute.xlu1 %1092 }
 0x524   : > { %3542 = vpow2.f32 %v1066_v9  ;;  %3265 = vmatpush3.msra.mxu1 %v1093_v10 }
 0x525   : > { %3274 = vmatprep.subr.mxu1 %v3811_v8 }
 0x528   : > { %v1056_v11 = vpop.xlane.xlu0 %1055 }
 0x529   : > { %v1062_v12 = vsub.f32 %v969_v59, %v1056_v11 }
 0x52b   : > { %v1068_v13 = vmul.f32 1.442695, %v1062_v12 }
 0x52c   : > { %v1059_v14 = vpop.xlane.xlu0 %1058 }
 0x52d   : > { %3544 = vpow2.f32 %v1068_v13  ;;  %v1063_v15 = vsub.f32 %v1045_v61, %v1059_v14  ;;  %v3071_v13 = vld [vmem:[#allocation7] ss:$0 sm:$0xff] }
 0x52e   : > { %v3543_v16 = vpop.eup %3542 }
 0x52f   : > { %v1070_v17 = vmul.f32 1.442695, %v1063_v15  ;;  %v1075_v18 = vsel %vm745_vm2, %v3543_v16, 0.0  ;;  %v3072_v15 = vld [vmem:[#allocation8] ss:$0 sm:$0xff] }
 0x530   : > { %1076 = vadd.xlane.f32.xlu0 %v1075_v18 }
 0x531   : > { %3546 = vpow2.f32 %v1070_v17 }
 0x537   : > { %v3545_v19 = vpop.eup %3544 }
 0x538   : > { %v1078_v20 = vsel %vm745_vm2, %v3545_v19, 0.0 }
 0x539   : > { %1079 = vadd.xlane.f32.xlu1 %v1078_v20  ;;  %v3505_v20 = vld [vmem:[%s4667_s13 + $0x8] sm:$0xff]  }
 0x53b   : > { %v3547_v21 = vpop.eup %3546 }
 0x53c   : > { %v1081_v22 = vsel %vm745_vm2, %v3547_v21, 0.0 }
 0x53d   : > { %1082 = vadd.xlane.f32.xlu0 %v1081_v22  ;;  %v3507_v22 = vld [vmem:[%s4667_s13 + $0x18] sm:$0xff]  }
 0x54a   : > { %1320 = vrot.lane.b32.xlu1 %v4206_v29, %s3818_s8 }
 0x553   : > { %1168 = vrot.lane.b32.xlu0 %v4198_v27, %s3818_s8 }
 0x554   : > { %v1074_v23 = vpop.xlane.xlu1 %1073 }
 0x555   : > { %3548 = vrcp.f32 %v1074_v23  ;;  %v3508_v23 = vld [vmem:[%s4667_s13 + $0x20] sm:$0xff]  }
 0x558   : > { %v1245_v26 = vpop.permute.xlu1 %1244 }
 0x55f   : > { %v3549_v24 = vpop.eup %3548 }
 0x560   : > { %v1088_v25 = vmul.f32 %v3549_v24, %v3541_v4  ;;  %v3509_v24 = vld [vmem:[%s4667_s13 + $0x28] sm:$0xff]  }
 0x562   : > { %3267 = vmatmul.mubr.msk.f32.vlgmr.msra.gmra.mrb[6].mxu1 %vm745_vm2, %v1088_v25  ;;  %v3510_v25 = vld [vmem:[%s4667_s13 + $0x30] sm:$0xff]  }
 0x563   : > { %3275 = vmatpush3.msra.mxu1 %v1245_v26  ;;  %3276 = vmatprep.mubr.msk.f32.mxu1 %vm3812_vm1, %v3811_v8  ;;  %v3511_v26 = vld [vmem:[%s4667_s13 + $0x38] sm:$0xff]  }
 0x564   : > { %3284 = vmatprep.subr.bf16.mxu1 %v3811_v8 }
 0x5bd   : > { %v1077_v28 = vpop.xlane.xlu0 %1076 }
 0x5be   : > { %3550 = vrcp.f32 %v1077_v28  ;;  %v3073_v28 = vld [vmem:[#allocation10] ss:$0 sm:$0xff] }
 0x5c6   : > { %v1080_v30 = vpop.xlane.xlu1 %1079 }
 0x5c7   : > { %3552 = vrcp.f32 %v1080_v30 }
 0x5c8   : > { %v3551_v31 = vpop.eup %3550 }
 0x5c9   : > { %v1089_v27 = vmul.f32 %v3551_v31, %v3543_v16 }
 0x5ca   : > { %v1083_v29 = vpop.xlane.xlu0 %1082  ;;  %v1321_v33 = vpop.permute.xlu1 %1320 }
 0x5cb   : > { %3554 = vrcp.f32 %v1083_v29 }
 0x5ce   : > { %v1169_v32 = vpop.permute.xlu0 %1168 }
 0x5cf   : > { %3270 = vmatpush3.msra.mxu0 %v1169_v32 }
 0x5d0   : > { %3272 = vmatmul.mubr.msk.f32.vlgmr.msra.gmra.mrb[6].mxu0 %vm745_vm2, %v1089_v27  ;;  %3279 = vmatprep.subr.mxu0 %v3811_v8 }
 0x5d1   : > { %v3553_v34 = vpop.eup %3552  ;;  %3280 = vmatpush3.msra.mxu0 %v1321_v33  ;;  %3281 = vmatprep.mubr.msk.f32.mxu0 %vm3812_vm1, %v3811_v8 }
 0x5d2   : > { %v1090_v35 = vmul.f32 %v3553_v34, %v3545_v19  ;;  %3292 = vmatprep.subr.bf16.mxu0 %v3811_v8  ;;  %v3504_v19 = vld [vmem:[%s4667_s13] sm:$0xff]  }
 0x5d4   : > { %3277 = vmatmul.mubr.msk.f32.vlgmr.msra.gmra.mrb[8].mxu1 %vm745_vm2, %v1090_v35 }
 0x5d5   : > { %v3555_v36 = vpop.eup %3554  ;;  %3288 = vmatprep.mubr.msk.bf16.mxu1 %vm3812_vm1, %v3811_v8  ;;  %3285 = vmatpush3.bf16.msra.mxu1 %v3500_v40 }
 0x5d6   : > { %v1091_v37 = vmul.f32 %v3555_v36, %v3547_v21  ;;  %3286 = vmatprep.subr.bf16.mxu1 %v3811_v8  ;;  %v3506_v21 = vld [vmem:[%s4667_s13 + $0x10] sm:$0xff]  }
 0x5d8   : > { %3282 = vmatmul.mubr.msk.f32.vlgmr.msra.gmra.mrb[8].mxu0 %vm745_vm2, %v1091_v37 }
 0x5d9   : > { %3296 = vmatprep.mubr.msk.bf16.mxu0 %vm3812_vm1, %v3811_v8  ;;  %3287 = vmatpush3.bf16.msra.mxu1 %v3501_v42 }
 0x5da   : > { %3300 = vmatprep.subr.bf16.mxu1 %v3811_v8  ;;  %3293 = vmatpush3.bf16.msra.mxu0 %v3502_v7  ;;  %v3092_v7 = vld [vmem:[%s4611_s5 + $0x1] ss:$0 sm:$0xff] }
 0x5db   : > { %3294 = vmatprep.subr.bf16.mxu0 %v3811_v8 }
 0x635   : > { %v1164_v38 = vpop.f32.mrb[6].mxu1 }
 0x636   : > { %v3268_v39 = vpop.f32.mrb[7].mxu1 }
 0x6a3   : > { %v1240_v43 = vpop.f32.mrb[6].mxu0 }
 0x6a4   : > { %1397 = vrot.lane.b32.xlu0 %v1240_v43, %s3819_s0  ;;  %v3273_v44 = vpop.f32.mrb[7].mxu0 }
 0x6a5   : > { %v3077_v44 = vld [vmem:[%s4668_s21] ss:$0 sm:$0xff]  ;;  %s3166_s21 = sshll.u32 %s3930_s25, 9  ;;  %s2902_s25 = scalar_lea.sflag [#allocation4], %s4131_s15 }
 0x6a7   : > { %v1316_v45 = vpop.f32.mrb[8].mxu1 }
 0x6a8   : > { %1401 = vrot.lane.b32.xlu1 %v1316_v45, %s3820_s14  ;;  %v3278_v46 = vpop.f32.mrb[9].mxu1 }
 0x6ab   : > { %v1392_v48 = vpop.f32.mrb[8].mxu0 }
 0x6ac   : > { %1405 = vrot.lane.b32.xlu0 %v1392_v48, %s4635_s11  ;;  %v3283_v49 = vpop.f32.mrb[9].mxu0  ;;  %s4672_s11 = sld [smem:[#allocation27_spill]] }
 0x716   : > { %v1398_v50 = vpop.permute.xlu0 %1397 }
 0x717   : > { %v1408_v52 = vsel %vm745_vm2, %v1164_v38, %v1398_v50 }
 0x71a   : > { %v1402_v51 = vpop.permute.xlu1 %1401 }
 0x71b   : > { %v1410_v53 = vsel %vm1409_vm6, %v1408_v52, %v1402_v51 }
 0x71e   : > { %v1406_v54 = vpop.permute.xlu0 %1405 }
 0x71f   : > { %v1412_v55 = vsel %vm1411_vm7, %v1410_v53, %v1406_v54 }
 0x720   : > { %v1413_v56 = vpack.c.bf16 %v1412_v55, %v1412_v55 }
 0x722   : > { %3289 = vmatmul.mubr.msk.bf16.vlgmr.msra.gmra.mrb[12].mxu1 %vm638_vm0, %v1413_v56 }
 0x723   : > { %3316 = vmatprep.mubr.msk.bf16.mxu1 %vm3812_vm1, %v3811_v8  ;;  %3301 = vmatpush3.bf16.msra.mxu1 %v3504_v19 }
 0x724   : > { %3302 = vmatprep.subr.bf16.mxu1 %v3811_v8 }
 0x727   : > { %3303 = vmatpush3.bf16.msra.mxu1 %v3505_v20 }
 0x728   : > { %3304 = vmatprep.subr.bf16.mxu1 %v3811_v8 }
 0x72b   : > { %3305 = vmatpush3.bf16.msra.mxu1 %v3506_v21 }
 0x72c   : > { %3306 = vmatprep.subr.bf16.mxu1 %v3811_v8 }
 0x72f   : > { %3307 = vmatpush3.bf16.msra.mxu1 %v3507_v22 }
 0x730   : > { %3308 = vmatprep.subr.bf16.mxu1 %v3811_v8 }
 0x733   : > { %3309 = vmatpush3.bf16.msra.mxu1 %v3508_v23 }
 0x734   : > { %3310 = vmatprep.subr.bf16.mxu1 %v3811_v8 }
 0x737   : > { %3311 = vmatpush3.bf16.msra.mxu1 %v3509_v24 }
 0x738   : > { %3312 = vmatprep.subr.bf16.mxu1 %v3811_v8 }
 0x73b   : > { %3313 = vmatpush3.bf16.msra.mxu1 %v3510_v25 }
 0x73c   : > { %3314 = vmatprep.subr.bf16.mxu1 %v3811_v8 }
 0x73f   : > { %3315 = vmatpush3.bf16.msra.mxu1 %v3511_v26 }
 0x740   : > { %3368 = vmatprep.subr.bf16.mxu1 %v3811_v8 }
 0x7f5   : > { %v1472_v58 = vpop.f32.mrb[12].mxu1 }
 0x7f6   : > { %v1473_v59 = vadd.f32 %v3067_v57, %v1472_v58  ;;  %v3290_v60 = vpop.f32.mrb[13].mxu1  ;;  %v3512_v58 = vld [vmem:[%s4610_s4 + $0x10] sm:$0xff]  }
 0x7f7   : > { %v1475_v61 = vpop.f32.mrb[14].mxu1 }
 0x7f8   : > { %v4295_v62 = vadd.f32 %v1473_v59, %v4153_v0  ;;  %v3291_v63 = vpop.f32.mrb[15].mxu1  ;;  %v3503_v0 = vld [vmem:[%s4616_s10 + $0x8] sm:$0xff]   ;;  %v3513_v59 = vld [vmem:[%s4610_s4 + $0x18] sm:$0xff]  }
 0x7f9   : > { %3295 = vmatpush3.bf16.msra.mxu0 %v3503_v0 }
 0x7fa   : > { %v1481_v1 = vsel %vm638_vm0, %v4295_v62, 0.0  ;;  %3320 = vmatprep.subr.bf16.mxu0 %v3811_v8 }
 0x7fb   : > { %1482 = vadd.xlane.f32.xlu1 %v1481_v1  ;;  %v3086_v1 = vld [vmem:[%s4608_s2 + $0x1] ss:$0 sm:$0xff] }
 0x888   : > { %v1483_v2 = vpop.xlane.xlu1 %1482 }
 0x889   : > { %v1484_v3 = vmul.f32 0.03125, %v1483_v2 }
 0x88b   : > { %v1485_v4 = vsub.f32 %v4295_v62, %v1484_v3  ;;  %v3087_v3 = vld [vmem:[%s4609_s3 + $0x1] ss:$0 sm:$0xff] }
 0x88d   : > { %v1486_v5 = vmul.f32 %v1485_v4, %v1485_v4 }
 0x88f   : > { %v1487_v6 = vsel %vm638_vm0, %v1486_v5, 0.0 }
 0x890   : > { %1488 = vadd.xlane.f32.xlu0 %v1487_v6 }
 0x91d   : > { %v1489_v9 = vpop.xlane.xlu0 %1488 }
 0x91e   : > { %v1490_v10 = vmul.f32 0.03125, %v1489_v9 }
 0x920   : > { %v1491_v11 = vadd.f32 1e-05, %v1490_v10 }
 0x922   : > { %3556 = vrsqrt.f32 %v1491_v11 }
 0x92c   : > { %v3557_v12 = vpop.eup %3556 }
 0x92d   : > { %v1493_v14 = vmul.f32 %v3557_v12, %v1485_v4 }
 0x92f   : > { %v1498_v16 = vmul.f32 %v3071_v13, %v1493_v14 }
 0x931   : > { %v1503_v17 = vadd.f32 %v3072_v15, %v1498_v16 }
 0x933   : > { %v1504_v18 = vpack.c.bf16 %v1503_v17, %v1503_v17 }
 0x935   : > { %3297 = vmatmul.mubr.msk.bf16.vlgmr.msra.gmra.mrb[12].mxu0 %vm638_vm0, %v1504_v18 }
 0x936   : > { %3324 = vmatprep.mubr.msk.bf16.mxu0 %vm3812_vm1, %v3811_v8  ;;  %3321 = vmatpush3.bf16.msra.mxu0 %v3512_v58 }
 0x937   : > { %3322 = vmatprep.subr.bf16.mxu0 %v3811_v8 }
 0x93a   : > { %3323 = vmatpush3.bf16.msra.mxu0 %v3513_v59 }
 0x93b   : > { %3328 = vmatprep.subr.mxu0 %v3811_v8 }
 0xa08   : > { %v1563_v30 = vpop.f32.mrb[12].mxu0 }
 0xa09   : > { %v1564_v29 = vadd.f32 %v3073_v28, %v1563_v30  ;;  %v3298_v31 = vpop.f32.mrb[13].mxu0 }
 0xa0a   : > { %v1566_v27 = vpop.f32.mrb[14].mxu0 }
 0xa0b   : > { %v1569_v32 = vmul.f32 %v1564_v29, %v1564_v29  ;;  %v3299_v33 = vpop.f32.mrb[15].mxu0 }
 0xa0d   : > { %v1570_v34 = vmul.f32 %v1569_v32, %v1564_v29 }
 0xa0f   : > { %v1571_v35 = vmul.f32 0.044715, %v1570_v34 }
 0xa11   : > { %v1572_v36 = vadd.f32 %v1571_v35, %v1564_v29 }
 0xa13   : > { %v1573_v37 = vmul.f32 0.7978846, %v1572_v36 }
 0xa15   : > { %3558 = vtanh.f32 %v1573_v37 }
 0xa1f   : > { %v3559_v38 = vpop.eup %3558 }
 0xa20   : > { %v1575_v39 = vadd.f32 1.0, %v3559_v38 }
 0xa22   : > { %v1576_v40 = vmul.f32 0.5, %v1575_v39 }
 0xa24   : > { %v1577_v42 = vmul.f32 %v1576_v40, %v1564_v29 }
 0xa26   : > { %v1578_v43 = vpack.c.bf16 %v1577_v42, %v1577_v42 }
 0xa28   : > { %3317 = vmatmul.mubr.bf16.vlgmr.msra.gmra.mrb[16].mxu1 %v1578_v43 }
 0xa29   : > { %3372 = vmatprep.mubr.msk.bf16.mxu1 %vm3812_vm1, %v3811_v8 }
 0xafb   : > { %v1682_v45 = vpop.f32.mrb[16].mxu1 }
 0xafc   : > { %v1683_v46 = vadd.f32 %v3077_v44, %v1682_v45  ;;  %v3318_v48 = vpop.f32.mrb[17].mxu1 }
 0xafd   : > { %v1685_v49 = vpop.f32.mrb[18].mxu1 }
 0xafe   : > { %v4350_v50 = vadd.f32 %v1683_v46, %v4295_v62  ;;  %v3319_v51 = vpop.f32.mrb[19].mxu1 }
 0xb00   : > { %v1691_v52 = vsel %vm638_vm0, %v4350_v50, 0.0 }
 0xb01   : > { %1692 = vadd.xlane.f32.xlu0 %v1691_v52 }
 0xb8e   : > { %v1693_v53 = vpop.xlane.xlu0 %1692 }
 0xb8f   : > { %v1694_v54 = vmul.f32 0.03125, %v1693_v53 }
 0xb91   : > { %v1695_v55 = vsub.f32 %v4350_v50, %v1694_v54 }
 0xb93   : > { %v1696_v56 = vmul.f32 %v1695_v55, %v1695_v55 }
 0xb95   : > { %v1697_v57 = vsel %vm638_vm0, %v1696_v56, 0.0 }
 0xb96   : > { %1698 = vadd.xlane.f32.xlu1 %v1697_v57 }
 0xc23   : > { %v1699_v60 = vpop.xlane.xlu1 %1698 }
 0xc24   : > { %v1700_v61 = vmul.f32 0.03125, %v1699_v60 }
 0xc26   : > { %v1701_v62 = vadd.f32 1e-05, %v1700_v61 }
 0xc28   : > { %3560 = vrsqrt.f32 %v1701_v62 }
 0xc32   : > { %v3561_v63 = vpop.eup %3560 }
 0xc33   : > { %v1703_v2 = vmul.f32 %v3561_v63, %v1695_v55 }
 0xc35   : > { %v1708_v4 = vmul.f32 %v3086_v1, %v1703_v2 }
 0xc37   : > { %v1713_v5 = vadd.f32 %v3087_v3, %v1708_v4 }
 0xc39   : > { %v1714_v6 = vpack.c.bf16 %v1713_v5, %v1713_v5 }
 0xc3b   : > { %3325 = vmatmul.mubr.msk.bf16.vlgmr.msra.gmra.mrb[16].mxu0 %vm638_vm0, %v1714_v6 }
 0xc3c   : > { %3330 = vmatprep.mubr.msk.f32.mxu0 %vm3812_vm1, %v3811_v8 }
 0xd0e   : > { %v1774_v0 = vpop.f32.mrb[16].mxu0 }
 0xd0f   : > { %v4376_v9 = vadd.f32 %v3092_v7, %v1774_v0  ;;  %v3326_v10 = vpop.f32.mrb[17].mxu0 }
 0xd10   : > { %v1777_v11 = vpop.f32.mrb[18].mxu0 }
 0xd11   : > { %1791 = vrot.lane.b32.xlu1 %v4376_v9, %s3815_s12  ;;  %1789 = vrot.lane.b32.xlu0 %v4376_v9, %s3814_s20  ;;  %v3327_v12 = vpop.f32.mrb[19].mxu0  ;;  %v1780_v13 = vmul.f32 0.35355338, %v4376_v9 }
 0xd15   : > { %1793 = vrot.lane.b32.xlu1 %v4376_v9, %s3813_s9  ;;  %1795 = vrot.lane.b32.xlu0 %v4376_v9, %s3816_s29 }
 0xd19   : > { %1782 = vrot.lane.b32.xlu0 %v1780_v13, %s3814_s20  ;;  %s4671_s20 = sld [smem:[#allocation26_spill]] }
 0xd1d   : > { %1784 = vrot.lane.b32.xlu0 %v1780_v13, %s3815_s12 }
 0xd21   : > { %1786 = vrot.lane.b32.xlu0 %v1780_v13, %s3813_s9  ;;  %s4673_s9 = sld [smem:[#allocation28_spill]] }
 0xd27   : > { %s4562_s12 = scalar_lea.hbm %s4673_s9, %s3166_s21 }
 0xd83   : > { %v1790_v14 = vpop.permute.xlu0 %1789  ;;  %v4391_v15 = vpop.permute.xlu1 %1791 }
 0xd84   : > { %1871 = vrot.lane.b32.xlu1 %v1790_v14, %s3816_s29 }
 0xd87   : > { %v1796_v16 = vpop.permute.xlu0 %1795  ;;  %v4397_v17 = vpop.permute.xlu1 %1793 }
 0xd88   : > { %1947 = vrot.lane.b32.xlu1 %v4391_v15, %s3816_s29  ;;  %3329 = vmatpush3.xpose.msk.msra.mxu0 %vm745_vm2, %v1796_v16 }
 0xd89   : > { %3333 = vmatprep.subr.mxu0 %v3811_v8 }
 0xd8b   : > { %3331 = vmatmul.mubr.msk.f32.vlgmr.msra.gmra.mrb[10].mxu0 %vm745_vm2, %v1780_v13  ;;  %v1783_v18 = vpop.permute.xlu0 %1782 }
 0xd8c   : > { %2023 = vrot.lane.b32.xlu1 %v4397_v17, %s3816_s29  ;;  %3335 = vmatprep.mubr.msk.f32.mxu0 %vm3812_vm1, %v3811_v8  ;;  %s3726_s29 = scalar_lea.vmem %s4564_s19, 512 }
 0xd8d   : > { %p3727_p3 = scmp.ne.s32.totalorder %s4564_s19, %s3726_s29 }
 0xd8f   : > { %v1785_v21 = vpop.permute.xlu0 %1784  ;;  %p3728_p10 = pnand %p3727_p3, %p4674_p7 }
 0xd91   : > { %p3729_p13 = pneg %p3728_p10 }
 0xd93   : > { %v1787_v23 = vpop.permute.xlu0 %1786 }
 0xdf6   : > { %v1872_v19 = vpop.permute.xlu1 %1871 }
 0xdf7   : > { %3334 = vmatpush3.xpose.msk.msra.mxu0 %vm745_vm2, %v1872_v19 }
 0xdf8   : > { %3338 = vmatprep.subr.mxu0 %v3811_v8 }
 0xdfa   : > { %v1948_v20 = vpop.permute.xlu1 %1947  ;;  %3336 = vmatmul.mubr.msk.f32.vlgmr.msra.gmra.mrb[20].mxu0 %vm745_vm2, %v1783_v18  ;;  %v3515_v18 = vld [vmem:[%s4612_s6 + $0x18] sm:$0xff]  }
 0xdfb   : > { %3339 = vmatpush3.xpose.msk.msra.mxu0 %vm745_vm2, %v1948_v20  ;;  %3340 = vmatprep.mubr.msk.f32.mxu0 %vm3812_vm1, %v3811_v8 }
 0xdfc   : > { %3343 = vmatprep.subr.mxu0 %v3811_v8 }
 0xdfe   : > { %v2024_v22 = vpop.permute.xlu1 %2023  ;;  %3341 = vmatmul.mubr.msk.f32.vlgmr.msra.gmra.mrb[22].mxu0 %vm745_vm2, %v1785_v21 }
 0xdff   : > { %3344 = vmatpush3.xpose.msk.msra.mxu0 %vm745_vm2, %v2024_v22  ;;  %3345 = vmatprep.mubr.msk.f32.mxu0 %vm3812_vm1, %v3811_v8 }
 0xe00   : > { %3348 = vmatprep.subr.mxu0 %v3811_v8 }
 0xe02   : > { %3346 = vmatmul.mubr.msk.f32.vlgmr.msra.gmra.mrb[24].mxu0 %vm745_vm2, %v1787_v23 }
 0xe03   : > { %3350 = vmatprep.mubr.msk.f32.mxu0 %vm3812_vm1, %v3811_v8 }
 0xe5e   : > { %v1867_v24 = vpop.f32.mrb[10].mxu0 }
 0xe5f   : > { %v1868_v25 = vadd.f32 %v1867_v24, %v4236_v47  ;;  %v3332_v26 = vpop.f32.mrb[11].mxu0 }
 0xe61   : > { %v2099_v28 = vsel %vm745_vm2, %v1868_v25, -inf }
 0xe62   : > { %2100 = vmax.xlane.f32.xlu1 %v2099_v28 }
 0xecd   : > { %v1943_v30 = vpop.f32.mrb[20].mxu0 }
 0xece   : > { %v1944_v29 = vadd.f32 %v1943_v30, %v4236_v47  ;;  %v3337_v31 = vpop.f32.mrb[21].mxu0 }
 0xed0   : > { %v2102_v27 = vsel %vm745_vm2, %v1944_v29, -inf }
 0xed1   : > { %2103 = vmax.xlane.f32.xlu0 %v2102_v27  ;;  %v2019_v32 = vpop.f32.mrb[22].mxu0 }
 0xed2   : > { %v2020_v33 = vadd.f32 %v2019_v32, %v4236_v47  ;;  %v3342_v34 = vpop.f32.mrb[23].mxu0  ;;  %v3112_v32 = vld [vmem:[%s4613_s7 + $0x1] ss:$0 sm:$0xff] }
 0xed4   : > { %v2105_v35 = vsel %vm745_vm2, %v2020_v33, -inf }
 0xed5   : > { %2106 = vmax.xlane.f32.xlu0 %v2105_v35  ;;  %v2095_v36 = vpop.f32.mrb[24].mxu0 }
 0xed6   : > { %v2096_v37 = vadd.f32 %v2095_v36, %v4236_v47  ;;  %v3347_v38 = vpop.f32.mrb[25].mxu0 }
 0xed8   : > { %v2108_v39 = vsel %vm745_vm2, %v2096_v37, -inf }
 0xed9   : > { %2109 = vmax.xlane.f32.xlu1 %v2108_v39 }
 0xeea   : > { %2219 = vrot.lane.b32.xlu1 %v1790_v14, %s3818_s8 }
 0xeef   : > { %v2101_v40 = vpop.xlane.xlu1 %2100 }
 0xef0   : > { %v2111_v42 = vsub.f32 %v1868_v25, %v2101_v40 }
 0xef2   : > { %v2115_v43 = vmul.f32 1.442695, %v2111_v42 }
 0xef4   : > { %3562 = vpow2.f32 %v2115_v43 }
 0xefe   : > { %v3563_v44 = vpop.eup %3562 }
 0xeff   : > { %v2123_v45 = vsel %vm745_vm2, %v3563_v44, 0.0 }
 0xf00   : > { %2124 = vadd.xlane.f32.xlu0 %v2123_v45 }
 0xf16   : > { %2143 = vrot.lane.b32.xlu0 %v4376_v9, %s3818_s8 }
 0xf5e   : > { %v2104_v46 = vpop.xlane.xlu0 %2103 }
 0xf5f   : > { %v2112_v48 = vsub.f32 %v1944_v29, %v2104_v46  ;;  %v3516_v46 = vld [vmem:[%s4616_s10 + $0x10] sm:$0xff]  }
 0xf61   : > { %v2117_v47 = vmul.f32 1.442695, %v2112_v48 }
 0xf62   : > { %v2107_v49 = vpop.xlane.xlu0 %2106 }
 0xf63   : > { %3564 = vpow2.f32 %v2117_v47  ;;  %v2113_v51 = vsub.f32 %v2020_v33, %v2107_v49 }
 0xf65   : > { %v2119_v52 = vmul.f32 1.442695, %v2113_v51 }
 0xf66   : > { %v2110_v53 = vpop.xlane.xlu1 %2109 }
 0xf67   : > { %3566 = vpow2.f32 %v2119_v52  ;;  %v2114_v54 = vsub.f32 %v2096_v37, %v2110_v53  ;;  %v3116_v52 = vld [vmem:[#allocation7 + $0x1] ss:$0 sm:$0xff] }
 0xf69   : > { %v2121_v55 = vmul.f32 1.442695, %v2114_v54  ;;  %v3117_v54 = vld [vmem:[#allocation8 + $0x1] ss:$0 sm:$0xff] }
 0xf6a   : > { %v2220_v3 = vpop.permute.xlu1 %2219 }
 0xf6b   : > { %3568 = vpow2.f32 %v2121_v55 }
 0xf6d   : > { %v3565_v56 = vpop.eup %3564 }
 0xf6e   : > { %v2126_v57 = vsel %vm745_vm2, %v3565_v56, 0.0 }
 0xf6f   : > { %2127 = vadd.xlane.f32.xlu1 %v2126_v57 }
 0xf71   : > { %v3567_v58 = vpop.eup %3566 }
 0xf72   : > { %v2129_v59 = vsel %vm745_vm2, %v3567_v58, 0.0 }
 0xf73   : > { %2130 = vadd.xlane.f32.xlu0 %v2129_v59  ;;  %v3519_v59 = vld [vmem:[%s4667_s13 + $0x48] sm:$0xff]  }
 0xf75   : > { %v3569_v60 = vpop.eup %3568 }
 0xf76   : > { %v2132_v61 = vsel %vm745_vm2, %v3569_v60, 0.0 }
 0xf77   : > { %2133 = vadd.xlane.f32.xlu1 %v2132_v61  ;;  %v3521_v61 = vld [vmem:[%s4667_s13 + $0x58] sm:$0xff]  }
 0xf88   : > { %2295 = vrot.lane.b32.xlu1 %v4391_v15, %s3818_s8 }
 0xf89   : > { %2371 = vrot.lane.b32.xlu0 %v4397_v17, %s3818_s8  ;;  %v3514_v17 = vld [vmem:[%s4612_s6 + $0x10] sm:$0xff]   ;;  %s4670_s8 = smov 24  }
 0xf8a   : > { %3369 = vmatpush3.bf16.msra.mxu1 %v3514_v17 }
 0xf8b   : > { %3370 = vmatprep.subr.bf16.mxu1 %v3811_v8 }
 0xf8d   : > { %v2125_v62 = vpop.xlane.xlu0 %2124 }
 0xf8e   : > { %3570 = vrcp.f32 %v2125_v62  ;;  %3371 = vmatpush3.bf16.msra.mxu1 %v3515_v18  ;;  %v3522_v62 = vld [vmem:[%s4667_s13 + $0x60] sm:$0xff]  }
 0xf8f   : > { %3384 = vmatprep.subr.bf16.mxu1 %v3811_v8 }
 0xf91   : > { %v2144_v63 = vpop.permute.xlu0 %2143 }
 0xf92   : > { %3349 = vmatpush3.msra.mxu0 %v2144_v63  ;;  %v3523_v63 = vld [vmem:[%s4667_s13 + $0x68] sm:$0xff]  }
 0xf93   : > { %3353 = vmatprep.subr.mxu0 %v3811_v8 }
 0xf98   : > { %v3571_v1 = vpop.eup %3570 }
 0xf99   : > { %v2139_v2 = vmul.f32 %v3571_v1, %v3563_v44  ;;  %v3524_v1 = vld [vmem:[%s4667_s13 + $0x70] sm:$0xff]  }
 0xf9b   : > { %3351 = vmatmul.mubr.msk.f32.vlgmr.msra.gmra.mrb[26].mxu0 %vm745_vm2, %v2139_v2  ;;  %v3525_v2 = vld [vmem:[%s4667_s13 + $0x78] sm:$0xff]  }
 0xf9c   : > { %3354 = vmatpush3.msra.mxu0 %v2220_v3  ;;  %3355 = vmatprep.mubr.msk.f32.mxu0 %vm3812_vm1, %v3811_v8  ;;  %v3526_v3 = vld [vmem:[%s4671_s20] ss:$16 sps:$4 sm:$0xff]  }
 0xf9d   : > { %3358 = vmatprep.subr.mxu0 %v3811_v8 }
 0xffc   : > { %v2128_v4 = vpop.xlane.xlu1 %2127 }
 0xffd   : > { %3572 = vrcp.f32 %v2128_v4  ;;  %v3528_v4 = vld [vmem:[%s4671_s20 + $0x4] ss:$16 sps:$4 sm:$0xff]  }
0x1000   : > { %v2131_v5 = vpop.xlane.xlu0 %2130 }
0x1001   : > { %3574 = vrcp.f32 %v2131_v5  ;;  %v3122_v5 = vld [vmem:[#allocation10 + $0x1] ss:$0 sm:$0xff] }
0x1004   : > { %v2134_v6 = vpop.xlane.xlu1 %2133  ;;  %v2372_v12 = vpop.permute.xlu0 %2371 }
0x1005   : > { %3576 = vrcp.f32 %v2134_v6 }
0x1007   : > { %v3573_v7 = vpop.eup %3572 }
0x1008   : > { %v2140_v0 = vmul.f32 %v3573_v7, %v3565_v56  ;;  %v2296_v9 = vpop.permute.xlu1 %2295 }
0x100a   : > { %3356 = vmatmul.mubr.msk.f32.vlgmr.msra.gmra.mrb[28].mxu0 %vm745_vm2, %v2140_v0 }
0x100b   : > { %v3575_v10 = vpop.eup %3574  ;;  %3359 = vmatpush3.msra.mxu0 %v2296_v9  ;;  %3360 = vmatprep.mubr.msk.f32.mxu0 %vm3812_vm1, %v3811_v8 }
0x100c   : > { %v2141_v11 = vmul.f32 %v3575_v10, %v3567_v58  ;;  %3363 = vmatprep.subr.mxu0 %v3811_v8  ;;  %v3518_v58 = vld [vmem:[%s4667_s13 + $0x40] sm:$0xff]  }
0x100e   : > { %3361 = vmatmul.mubr.msk.f32.vlgmr.msra.gmra.mrb[30].mxu0 %vm745_vm2, %v2141_v11 }
0x100f   : > { %v3577_v13 = vpop.eup %3576  ;;  %3364 = vmatpush3.msra.mxu0 %v2372_v12  ;;  %3365 = vmatprep.mubr.msk.f32.mxu0 %vm3812_vm1, %v3811_v8 }
0x1010   : > { %v2142_v14 = vmul.f32 %v3577_v13, %v3569_v60  ;;  %3376 = vmatprep.subr.bf16.mxu0 %v3811_v8  ;;  %v3520_v60 = vld [vmem:[%s4667_s13 + $0x50] sm:$0xff]  }
0x1012   : > { %3366 = vmatmul.mubr.msk.f32.vlgmr.msra.gmra.mrb[32].mxu0 %vm745_vm2, %v2142_v14 }
0x1013   : > { %3380 = vmatprep.mubr.msk.bf16.mxu0 %vm3812_vm1, %v3811_v8  ;;  %3377 = vmatpush3.bf16.msra.mxu0 %v3516_v46 }
0x1014   : > { %3378 = vmatprep.subr.bf16.mxu0 %v3811_v8 }
0x106e   : > { %v2215_v15 = vpop.f32.mrb[26].mxu0 }
0x106f   : > { %v3352_v16 = vpop.f32.mrb[27].mxu0 }
0x10dd   : > { %v2291_v19 = vpop.f32.mrb[28].mxu0 }
0x10de   : > { %2448 = vrot.lane.b32.xlu1 %v2291_v19, %s3819_s0  ;;  %v3357_v20 = vpop.f32.mrb[29].mxu0 }
0x10df   : > { %v3531_v20 = vld [vmem:[%s4671_s20 + $0x24] ss:$16 sps:$4 sm:$0xff]  }
0x10e1   : > { %v2367_v21 = vpop.f32.mrb[30].mxu0 }
0x10e2   : > { %2452 = vrot.lane.b32.xlu0 %v2367_v21, %s3820_s14  ;;  %v3362_v22 = vpop.f32.mrb[31].mxu0  ;;  %v3529_v21 = vld [vmem:[%s4671_s20 + $0x20] ss:$16 sps:$4 sm:$0xff]  }
0x10e3   : > { %v3822_v22 = vmov 0  }
0x10e5   : > { %v2443_v23 = vpop.f32.mrb[32].mxu0 }
0x10e6   : > { %2456 = vrot.lane.b32.xlu1 %v2443_v23, %s4670_s8  ;;  %v3367_v24 = vpop.f32.mrb[33].mxu0  ;;  %v3534_v23 = vld [vmem:[%s4671_s20 + $0xc] ss:$16 sps:$4 sm:$0xff]   ;;  %s3823_s8 = smov [#allocation11]  }
0x10e7   : > { %v3142_v24 = vld [vmem:[%s4669_s18 + $0x1] ss:$0 sm:$0xff]  ;;  %s3730_s0 = sshll.u32 %s3823_s8, 4  ;;  %s3731_s0 = int_to_ptr.vmem [resolvable:$false] %s3730_s0 }
0x10e8   : > { %s3732_s14 = scalar_lea.vmem %s3731_s0, 1024  ;;  %p3733_p5 = scmp.lt.s32.totalorder %s4564_s19, %s3731_s0 }
0x10e9   : > { %p3734_p9 = scmp.lt.s32.totalorder %s3732_s14, %s3726_s29 }
0x10eb   : > { %p3735_p1 = por %p3734_p9, %p3733_p5 }
0x10ed   : > { %p3736_p2 = pnand %p3735_p1, %p3729_p13 }
0x1150   : > { %v2449_v25 = vpop.permute.xlu1 %2448 }
0x1151   : > { %v2459_v28 = vsel %vm745_vm2, %v2215_v15, %v2449_v25 }
0x1154   : > { %v2453_v26 = vpop.permute.xlu0 %2452 }
0x1155   : > { %v2460_v30 = vsel %vm1409_vm6, %v2459_v28, %v2453_v26 }
0x1158   : > { %v2457_v29 = vpop.permute.xlu1 %2456 }
0x1159   : > { %v2461_v31 = vsel %vm1411_vm7, %v2460_v30, %v2457_v29 }
0x115a   : > { %v2462_v27 = vpack.c.bf16 %v2461_v31, %v2461_v31 }
0x115c   : > { %3373 = vmatmul.mubr.msk.bf16.vlgmr.msra.gmra.mrb[20].mxu1 %vm638_vm0, %v2462_v27  ;;  %v3532_v27 = vld [vmem:[%s4671_s20 + $0x8] ss:$16 sps:$4 sm:$0xff]  }
0x115d   : > { %3400 = vmatprep.mubr.msk.bf16.mxu1 %vm3812_vm1, %v3811_v8  ;;  %3385 = vmatpush3.bf16.msra.mxu1 %v3518_v58 }
0x115e   : > { %3386 = vmatprep.subr.bf16.mxu1 %v3811_v8 }
0x1161   : > { %3387 = vmatpush3.bf16.msra.mxu1 %v3519_v59 }
0x1162   : > { %3388 = vmatprep.subr.bf16.mxu1 %v3811_v8 }
0x1165   : > { %3389 = vmatpush3.bf16.msra.mxu1 %v3520_v60 }
0x1166   : > { %3390 = vmatprep.subr.bf16.mxu1 %v3811_v8 }
0x1169   : > { %3391 = vmatpush3.bf16.msra.mxu1 %v3521_v61 }
0x116a   : > { %3392 = vmatprep.subr.bf16.mxu1 %v3811_v8 }
0x116d   : > { %3393 = vmatpush3.bf16.msra.mxu1 %v3522_v62 }
0x116e   : > { %3394 = vmatprep.subr.bf16.mxu1 %v3811_v8 }
0x1171   : > { %3395 = vmatpush3.bf16.msra.mxu1 %v3523_v63 }
0x1172   : > { %3396 = vmatprep.subr.bf16.mxu1 %v3811_v8 }
0x1175   : > { %3397 = vmatpush3.bf16.msra.mxu1 %v3524_v1 }
0x1176   : > { %3398 = vmatprep.subr.bf16.mxu1 %v3811_v8 }
0x1179   : > { %3399 = vmatpush3.bf16.msra.mxu1 %v3525_v2 }
0x122f   : > { %v2522_v33 = vpop.f32.mrb[20].mxu1 }
0x1230   : > { %v2523_v34 = vadd.f32 %v3112_v32, %v2522_v33  ;;  %v3374_v35 = vpop.f32.mrb[21].mxu1  ;;  %v3537_v33 = vld [vmem:[%s4671_s20 + $0x2c] ss:$16 sps:$4 sm:$0xff]  }
0x1231   : > { %v2525_v36 = vpop.f32.mrb[22].mxu1  ;;  %v612_v35 = vsub.s32 0, %v4233_v41 }
0x1232   : > { %v4475_v37 = vadd.f32 %v2523_v34, %v4350_v50  ;;  %v3375_v38 = vpop.f32.mrb[23].mxu1  ;;  %v3517_v50 = vld [vmem:[%s4616_s10 + $0x18] sm:$0xff]   ;;  %v2750_v36 = vld [vmem:[%s4672_s11] sm:$0xf] }
0x1233   : > { %3379 = vmatpush3.bf16.msra.mxu0 %v3517_v50  ;;  %v3535_v34 = vld [vmem:[%s4671_s20 + $0x28] ss:$16 sps:$4 sm:$0xff]   ;;  %v2755_v38 = vrot.slane %v2750_v36, %v612_v35  ;;  %v2766_v50 = vsub.s32 3, %v4233_v41 }
0x1234   : > { %v2531_v39 = vsel %vm638_vm0, %v4475_v37, 0.0  ;;  %2815 = vmatprep.subr.bf16.mxu0 %v3528_v4 }
0x1235   : > { %2532 = vadd.xlane.f32.xlu0 %v2531_v39 }
0x12c2   : > { %v2533_v40 = vpop.xlane.xlu0 %2532 }
0x12c3   : > { %v2534_v42 = vmul.f32 0.03125, %v2533_v40 }
0x12c5   : > { %v2535_v43 = vsub.f32 %v4475_v37, %v2534_v42 }
0x12c7   : > { %v2536_v44 = vmul.f32 %v2535_v43, %v2535_v43 }
0x12c9   : > { %v2537_v45 = vsel %vm638_vm0, %v2536_v44, 0.0  ;;  %v2762_v44 = vsub.s32 2, %v4233_v41 }
0x12ca   : > { %2538 = vadd.xlane.f32.xlu1 %v2537_v45 }
0x1357   : > { %v2539_v48 = vpop.xlane.xlu1 %2538 }
0x1358   : > { %v2540_v47 = vmul.f32 0.03125, %v2539_v48 }
0x135a   : > { %v2541_v49 = vadd.f32 1e-05, %v2540_v47  ;;  %v2763_v47 = vrot.slane %v2750_v36, %v2762_v44 }
0x135c   : > { %3578 = vrsqrt.f32 %v2541_v49  ;;  %v2767_v49 = vrot.slane %v2750_v36, %v2766_v50 }
0x1366   : > { %v3579_v51 = vpop.eup %3578 }
0x1367   : > { %v2543_v53 = vmul.f32 %v3579_v51, %v2535_v43 }
0x1369   : > { %v2548_v55 = vmul.f32 %v3116_v52, %v2543_v53 }
0x136b   : > { %v2553_v56 = vadd.f32 %v3117_v54, %v2548_v55 }
0x136d   : > { %v2554_v57 = vpack.c.bf16 %v2553_v56, %v2553_v56 }
0x136f   : > { %3381 = vmatmul.mubr.msk.bf16.vlgmr.msra.gmra.mrb[36].mxu0 %vm638_vm0, %v2554_v57 }
0x1370   : > { %2816 = vmatpush1.bf16.msra.mxu0 %v3526_v3  ;;  %2847 = vmatprep.mubr.bf16.mxu0 %v3822_v22 }
0x1371   : > { %2817 = vmatprep.subr.bf16.mxu0 %v3531_v20 }
0x1374   : > { %2818 = vmatpush1.bf16.msra.mxu0 %v3529_v21 }
0x1375   : > { %2856 = vmatprep.subr.bf16.mxu0 %v3534_v23 }
0x1442   : > { %v2614_v6 = vpop.f32.mrb[36].mxu0 }
0x1443   : > { %v2615_v7 = vadd.f32 %v3122_v5, %v2614_v6  ;;  %v3382_v0 = vpop.f32.mrb[37].mxu0 }
0x1444   : > { %v2617_v9 = vpop.f32.mrb[38].mxu0 }
0x1445   : > { %v2620_v10 = vmul.f32 %v2615_v7, %v2615_v7  ;;  %v3383_v11 = vpop.f32.mrb[39].mxu0 }
0x1447   : > { %v2621_v12 = vmul.f32 %v2620_v10, %v2615_v7 }
0x1449   : > { %v2622_v8 = vmul.f32 0.044715, %v2621_v12 }
0x144b   : > { %v2623_v13 = vadd.f32 %v2622_v8, %v2615_v7 }
0x144d   : > { %v2624_v14 = vmul.f32 0.7978846, %v2623_v13 }
0x144f   : > { %3580 = vtanh.f32 %v2624_v14 }
0x1459   : > { %v3581_v15 = vpop.eup %3580 }
0x145a   : > { %v2626_v16 = vadd.f32 1.0, %v3581_v15 }
0x145c   : > { %v2627_v17 = vmul.f32 0.5, %v2626_v16 }
0x145e   : > { %v2628_v18 = vmul.f32 %v2627_v17, %v2615_v7 }
0x1460   : > { %v2629_v19 = vpack.c.bf16 %v2628_v18, %v2628_v18 }
0x1462   : > { %3401 = vmatmul.mubr.bf16.vlgmr.msra.gmra.mrb[24].mxu1 %v2629_v19 }
0x1535   : > { %v2734_v25 = vpop.f32.mrb[24].mxu1 }
0x1536   : > { %v2735_v26 = vadd.f32 %v3142_v24, %v2734_v25  ;;  %v3402_v28 = vpop.f32.mrb[25].mxu1 }
0x1537   : > { %v2737_v30 = vpop.f32.mrb[26].mxu1 }
0x1538   : > { %v2740_v29 = vadd.f32 %v2735_v26, %v4475_v37  ;;  %v3403_v31 = vpop.f32.mrb[27].mxu1  ;;  %v2758_v37 = vsub.s32 1, %v4233_v41 }
0x153a   : > { %v2741_v32 = vpack.c.bf16 %v2740_v29, %v2740_v29  ;;  %v2759_v39 = vrot.slane %v2750_v36, %v2758_v37 }
0x153c   : > { %3159 = vmatmul.mubr.msk.bf16.vlgmr.msra.gmra.mrb[40].mxu0 %vm638_vm0, %v2741_v32 }
0x153d   : > { %2857 = vmatpush1.bf16.msra.mxu0 %v3532_v27  ;;  %2888 = vmatprep.mubr.bf16.mxu0 %v3822_v22 }
0x153e   : > { %2858 = vmatprep.subr.bf16.mxu0 %v3537_v33 }
0x1541   : > { %2859 = vmatpush1.bf16.msra.mxu0 %v3535_v34 }
0x1544   : > { %3160 = vmatmul.mubr.msk.bf16.vlgmr.msra.gmra.mrb[44].mxu0 %vm638_vm0, %v2741_v32 }
0x160f   : > { %v2849_v40 = vpop.f32.mrb[40].mxu0 }
0x1610   : > { %v2850_v42 = vadd.f32 %v2849_v40, %v2755_v38  ;;  %v2851_v43 = vpop.f32.mrb[41].mxu0 }
0x1611   : > { %v2852_v45 = vadd.f32 %v2851_v43, %v2759_v39  ;;  %v2853_v46 = vpop.f32.mrb[42].mxu0 }
0x1612   : > { %2897 = vst [vmem:[%s607_s28] sm:$0xff] %v2850_v42  ;;  %v2854_v48 = vpop.f32.mrb[43].mxu0 }
0x1613   : > { %2898 = vst [vmem:[%s607_s28 + $0x8] sm:$0xff] %v2852_v45 }
0x1617   : > { %v2890_v51 = vpop.f32.mrb[44].mxu0 }
0x1618   : > { %v2891_v52 = vadd.f32 %v2890_v51, %v2763_v47  ;;  %v2892_v53 = vpop.f32.mrb[45].mxu0 }
0x1619   : > { %v2893_v54 = vadd.f32 %v2892_v53, %v2767_v49  ;;  %v2894_v55 = vpop.f32.mrb[46].mxu0 }
0x161a   : > { %2899 = vst [vmem:[%s607_s28 + $0x10] sm:$0xff] %v2891_v52  ;;  %v2895_v41 = vpop.f32.mrb[47].mxu0 }
0x161b   : > { %2900 = vst [vmem:[%s607_s28 + $0x18] sm:$0xff] %v2893_v54 }
0x161c   : > { %3739 = shalt.err (!%p3736_p2)
}
0x161d   : > { %s3740_s15 = scalar_lea.hbm %s4562_s12, 512  ;;  %s3744_s28 = scalar_lea.hbm %s4673_s9, 1024 }
0x161e   : > { %p3741_p12 = scmp.ne.s32.totalorder %s4562_s12, %s3740_s15  ;;  %p3745_p11 = scmp.lt.u32.totalorder %s4562_s12, %s4673_s9 }
0x161f   : > { %p3746_p4 = scmp.lt.u32.totalorder %s3744_s28, %s3740_s15  ;;  %p3748_p3 = scmp.lt.u32.totalorder %s3740_s15, %s4562_s12 }
0x1620   : > { %p3742_p0 = pnand %p3741_p12, %p4674_p7 }
0x1621   : > { %p3747_p8 = por %p3746_p4, %p3745_p11 }
0x1622   : > { %p3743_p6 = pneg %p3742_p0 }
0x1623   : > { %p3749_p10 = por %p3748_p3, %p3747_p8 }
0x1625   : > { %p3750_p13 = pnand %p3749_p10, %p3743_p6 }
0x1627   : > { %3753 = shalt.err (!%p3750_p13)
}
0x1628   : > { %3420 = dma.vmem_to_hbm [thread:$0]  (%p4674_p7), %s4564_s19, 512, %s4562_s12, %s2902_s25  }
0x1629 PF: > { %s4675_s27 = sld [smem:[#allocation17_spill]]  ;;  %s4676_s29 = sld [smem:[#allocation18_spill]] }
0x162a   : > { %p4678_p9 = scmp.ge.s32.totalorder %s3804_s24, 2 }
0x162f   : > { %s2928_s8 = sand.u32 1, %s4675_s27   ;;  %p4677_p5 = scmp.ne.s32.totalorder %s4676_s29, 0 }
0x1630   : > { %s2929_s0 = scalar_lea.sflag [#allocation4], %s2928_s8 }
0x1631   : > { %p3440_p1 = pnand %p4678_p9, %p4677_p5 }
0x1633   : > { %3787 = dma.done.wait (!%p3440_p1), %s2929_s0, 512  }
0x1634   : > { %3789 = vsyncadd (!%p3440_p1), %s2929_s0, 4294966784  ;;  %s4679_s14 = sld [smem:[#allocation19_spill]]  ;;  %p33_p2 = scmp.ge.s32.totalorder %s4037_s17, 4  }
0x1635   : > { %s4680_s21 = smov %s3796_s22  ;;  %s4681_s22 = smov %s3800_s23 }
0x1636   : > { %s4683_s24 = smov %s4037_s17  ;;  %35 = sbr.rel (!%p33_p2) target bundleno = 18 (0x12), region = 158 }
0x163a   : > { %s4682_s23 = smov %s4679_s14 }
0x163d   :  { %2934 = vsyncpa [#allocation3], 1 }
0x163e   :  { %2936 = vsyncpa [#allocation3 + $0x1], 1 }
0x163f   :  { %2937 = vsyncpa [#allocation6], 1 }
0x1640   :  { %2939 = vsyncpa [#allocation6 + $0x1], 1 }
0x1641   :  { %2940 = vsyncpa [#allocation9], 1 }
0x1642   :  { %2941 = vsyncpa [#allocation4], 1 }
0x1643   :  { %2943 = vsyncpa [#allocation4 + $0x1], 1 }

</bundles_post_ra>
